<compile_context>
chip_gen: v5e
topology: v5e:2x2
jax: 0.10.0
libtpu: 0.0.40
codegen_flags: <defaults>
</compile_context>

<pallas_src>
import math
import functools

import jax
import jax.numpy as jnp
from jax.experimental import pallas as pl
from jax.experimental.pallas import tpu as pltpu


def mha_kernel(q_ref, k_ref, v_ref,
               wq_ref, wk_ref, wv_ref, wo_ref,
               bq_ref, bk_ref, bv_ref, bo_ref,
               o_ref, ctx_ref, *, num_heads):
    """One batch element of multi-head attention.

    q_ref/k_ref/v_ref : (S, D) bf16 activations of this batch element
    wq/wk/wv/wo_ref   : (D, D) bf16 projection weights (wq pre-scaled by 1/sqrt(hd))
    bq/bk/bv/bo_ref   : (1, D) f32 biases (bq pre-scaled by 1/sqrt(hd))
    o_ref             : (S, D) f32 output
    ctx_ref           : (S, D) bf16 VMEM scratch holding the concatenated heads
    """
    S, D = q_ref.shape
    H = num_heads
    hd = D // H
    f32 = jnp.float32

    # Full-width QKV projections: contraction depth D, output width D on the MXU.
    qp = (jnp.dot(q_ref[...], wq_ref[...], preferred_element_type=f32)
          + bq_ref[...]).astype(jnp.bfloat16)                       # (S, D)
    kp = (jnp.dot(k_ref[...], wk_ref[...], preferred_element_type=f32)
          + bk_ref[...]).astype(jnp.bfloat16)
    vp = (jnp.dot(v_ref[...], wv_ref[...], preferred_element_type=f32)
          + bv_ref[...]).astype(jnp.bfloat16)

    # Per-head scaled-dot-product attention, unrolled over the small head count.
    # The 1/sqrt(hd) scale is already folded into wq/bq, so no per-score multiply.
    for h in range(H):
        lo, hi = h * hd, (h + 1) * hd
        q_h = qp[:, lo:hi]                                          # (S, hd) bf16
        k_h = kp[:, lo:hi]
        v_h = vp[:, lo:hi]

        # scores = q_h @ k_h^T  (contract last dims of both -> no explicit transpose)
        s = jax.lax.dot_general(q_h, k_h, (((1,), (1,)), ((), ())),
                                preferred_element_type=f32)         # (S, S) f32
        s = s - jnp.max(s, axis=-1, keepdims=True)
        e = jnp.exp(s)
        p = e * pl.reciprocal(jnp.sum(e, axis=-1, keepdims=True), approx=True)

        ctx_h = jnp.dot(p.astype(jnp.bfloat16), v_h,
                        preferred_element_type=f32)                 # (S, hd) f32
        ctx_ref[:, lo:hi] = ctx_h.astype(jnp.bfloat16)

    # One full-width output projection over the concatenated heads.
    out = jnp.dot(ctx_ref[...], wo_ref[...], preferred_element_type=f32) + bo_ref[...]
    o_ref[...] = out.astype(o_ref.dtype)


def multihead_attention(query, key, value, params, num_heads, mask=None):
    """query/key/value: (B, S, D).  params from pack_params.  mask unsupported."""
    assert mask is None  # TODO(synk): additive mask not implemented (mask=None only)
    B, S, D = query.shape
    assert D % num_heads == 0

    kernel = functools.partial(mha_kernel, num_heads=num_heads)
    act_spec = pl.BlockSpec((pl.Squeezed(), S, D), lambda b: (b, 0, 0))
    w_spec = pl.BlockSpec((D, D), lambda b: (0, 0))     # constant -> VMEM-resident
    b_spec = pl.BlockSpec((1, D), lambda b: (0, 0))

    return pl.pallas_call(
        kernel,
        out_shape=jax.ShapeDtypeStruct((B, S, D), jnp.float32),
        grid=(B,),                                       # fully parallel grid
        in_specs=[act_spec, act_spec, act_spec,
                  w_spec, w_spec, w_spec, w_spec,
                  b_spec, b_spec, b_spec, b_spec],
        out_specs=pl.BlockSpec((pl.Squeezed(), S, D), lambda b: (b, 0, 0)),
        scratch_shapes=[pltpu.VMEM((S, D), jnp.bfloat16)],
        compiler_params=pltpu.CompilerParams(dimension_semantics=("parallel",)),
    )(query.astype(jnp.bfloat16), key.astype(jnp.bfloat16), value.astype(jnp.bfloat16),
      params["w_q"], params["w_k"], params["w_v"], params["w_o"],
      params["b_q"], params["b_k"], params["b_v"], params["b_o"])


def pack_params(wq, bq, wk, bk, wv, bv, wo, bo, num_heads):
    """Repack (in,out) weights / (out,) biases; fold 1/sqrt(head_dim) into W_q/b_q."""
    D = wq.shape[0]
    hd = D // num_heads
    scale = 1.0 / math.sqrt(hd)                          # power of two for hd=16 -> exact
    return {
        "w_q": (wq.astype(jnp.float32) * scale).astype(jnp.bfloat16),
        "w_k": jnp.asarray(wk, jnp.bfloat16),
        "w_v": jnp.asarray(wv, jnp.bfloat16),
        "w_o": jnp.asarray(wo, jnp.bfloat16),
        "b_q": (bq * scale).reshape(1, D).astype(jnp.float32),
        "b_k": bk.reshape(1, D).astype(jnp.float32),
        "b_v": bv.reshape(1, D).astype(jnp.float32),
        "b_o": bo.reshape(1, D).astype(jnp.float32),
    }


def mha_reference(query, key, value, wq, bq, wk, bk, wv, bv, wo, bo, num_heads):
    """Pure-JAX reference matching the PyTorch module (dropout=identity, mask=None)."""
    B, S, D = query.shape
    H = num_heads
    hd = D // H
    q = (query @ wq + bq).reshape(B, S, H, hd).transpose(0, 2, 1, 3)
    k = (key   @ wk + bk).reshape(B, S, H, hd).transpose(0, 2, 1, 3)
    v = (value @ wv + bv).reshape(B, S, H, hd).transpose(0, 2, 1, 3)
    s = jnp.einsum("bhqd,bhkd->bhqk", q, k) / math.sqrt(hd)
    p = jax.nn.softmax(s, axis=-1)
    ctx = jnp.einsum("bhqk,bhkd->bhqd", p, v)
    ctx = ctx.transpose(0, 2, 1, 3).reshape(B, S, D)
    return ctx @ wo + bo


if __name__ == "__main__":
    d_model, num_heads = 128, 8      # lane-dense d_model; head_dim = 16
    B, S = 2, 16

    root = jax.random.PRNGKey(0)
    kq, kk, kv, kw = jax.random.split(root, 4)
    query  = jax.random.normal(kq, (B, S, d_model), jnp.float32)
    key_in = jax.random.normal(kk, (B, S, d_model), jnp.float32)
    value  = jax.random.normal(kv, (B, S, d_model), jnp.float32)

    wkeys = jax.random.split(kw, 8)
    wscale = 1.0 / math.sqrt(d_model)
    # (in, out) weights (== PyTorch nn.Linear weight.T)
    wq = (wscale * jax.random.normal(wkeys[0], (d_model, d_model))).astype(jnp.bfloat16)
    wk = (wscale * jax.random.normal(wkeys[1], (d_model, d_model))).astype(jnp.bfloat16)
    wv = (wscale * jax.random.normal(wkeys[2], (d_model, d_model))).astype(jnp.bfloat16)
    wo = (wscale * jax.random.normal(wkeys[3], (d_model, d_model))).astype(jnp.bfloat16)
    bq = 0.1 * jax.random.normal(wkeys[4], (d_model,), jnp.float32)
    bk = 0.1 * jax.random.normal(wkeys[5], (d_model,), jnp.float32)
    bv = 0.1 * jax.random.normal(wkeys[6], (d_model,), jnp.float32)
    bo = 0.1 * jax.random.normal(wkeys[7], (d_model,), jnp.float32)

    params = pack_params(wq, bq, wk, bk, wv, bv, wo, bo, num_heads)

    out = multihead_attention(query, key_in, value, params, num_heads)
    out = jax.block_until_ready(out)
    assert out.shape == (B, S, d_model) and out.dtype == jnp.float32

    # Correctness check against a pure-JAX f32 reference using the same
    # bf16-rounded activations and weights as the kernel sees.
    qf = query.astype(jnp.bfloat16).astype(jnp.float32)
    kf = key_in.astype(jnp.bfloat16).astype(jnp.float32)
    vf = value.astype(jnp.bfloat16).astype(jnp.float32)
    with jax.default_matmul_precision("float32"):
        ref = mha_reference(qf, kf, vf,
                            wq.astype(jnp.float32), bq, wk.astype(jnp.float32), bk,
                            wv.astype(jnp.float32), bv, wo.astype(jnp.float32), bo,
                            num_heads)
    assert jnp.allclose(out, ref, atol=5e-2, rtol=5e-2), \
        f"max abs err {float(jnp.max(jnp.abs(out - ref)))}"

    print("KERNEL_OK")
</pallas_src>

<mosaic_0001>
module attributes {stable_mosaic.version = 11 : i64} {
  func.func @mha_kernel(%arg0: i32, %arg1: memref<1x16x128xbf16, #tpu.memory_space<vmem>>, %arg2: memref<1x16x128xbf16, #tpu.memory_space<vmem>>, %arg3: memref<1x16x128xbf16, #tpu.memory_space<vmem>>, %arg4: memref<128x128xbf16, #tpu.memory_space<vmem>>, %arg5: memref<128x128xbf16, #tpu.memory_space<vmem>>, %arg6: memref<128x128xbf16, #tpu.memory_space<vmem>>, %arg7: memref<128x128xbf16, #tpu.memory_space<vmem>>, %arg8: memref<1x128xf32, #tpu.memory_space<vmem>>, %arg9: memref<1x128xf32, #tpu.memory_space<vmem>>, %arg10: memref<1x128xf32, #tpu.memory_space<vmem>>, %arg11: memref<1x128xf32, #tpu.memory_space<vmem>>, %arg12: memref<1x16x128xf32, #tpu.memory_space<vmem>>, %arg13: memref<16x128xbf16, #tpu.memory_space<vmem>>) attributes {dimension_semantics = [#tpu.dimension_semantics<parallel>], iteration_bounds = array<i64: 2>, scalar_prefetch = 0 : i64, scratch_operands = 1 : i64, tpu.core_type = #tpu.core_type<tc>, window_params = [{transform_indices = @transform_0, window_bounds = array<i64: 1, 16, 128>}, {transform_indices = @transform_1, window_bounds = array<i64: 1, 16, 128>}, {transform_indices = @transform_2, window_bounds = array<i64: 1, 16, 128>}, {pipeline_mode = #tpu.pipeline_mode<synchronous>, transform_indices = @transform_3, window_bounds = array<i64: 128, 128>}, {pipeline_mode = #tpu.pipeline_mode<synchronous>, transform_indices = @transform_4, window_bounds = array<i64: 128, 128>}, {pipeline_mode = #tpu.pipeline_mode<synchronous>, transform_indices = @transform_5, window_bounds = array<i64: 128, 128>}, {pipeline_mode = #tpu.pipeline_mode<synchronous>, transform_indices = @transform_6, window_bounds = array<i64: 128, 128>}, {pipeline_mode = #tpu.pipeline_mode<synchronous>, transform_indices = @transform_7, window_bounds = array<i64: 1, 128>}, {pipeline_mode = #tpu.pipeline_mode<synchronous>, transform_indices = @transform_8, window_bounds = array<i64: 1, 128>}, {pipeline_mode = #tpu.pipeline_mode<synchronous>, transform_indices = @transform_9, window_bounds = array<i64: 1, 128>}, {pipeline_mode = #tpu.pipeline_mode<synchronous>, transform_indices = @transform_10, window_bounds = array<i64: 1, 128>}, {transform_indices = @transform_11, window_bounds = array<i64: 1, 16, 128>}]} {
    %c0 = arith.constant 0 : index
    %c0_0 = arith.constant 0 : index
    %c0_1 = arith.constant 0 : index
    %0 = vector.load %arg1[%c0, %c0_0, %c0_1] : memref<1x16x128xbf16, #tpu.memory_space<vmem>>, vector<1x16x128xbf16>
    %1 = vector.shape_cast %0 : vector<1x16x128xbf16> to vector<16x128xbf16>
    %c0_2 = arith.constant 0 : index
    %c0_3 = arith.constant 0 : index
    %2 = vector.load %arg4[%c0_2, %c0_3] : memref<128x128xbf16, #tpu.memory_space<vmem>>, vector<128x128xbf16>
    %cst = arith.constant dense<0.000000e+00> : vector<16x128xf32>
    %3 = tpu.matmul %1, %2, %cst {dimension_numbers = #tpu.dot_dimension_numbers<[1], [0], [0], [1], [0, 0, 1, 1], [], []>} : vector<16x128xbf16>, vector<128x128xbf16>, vector<16x128xf32> -> vector<16x128xf32>
    %c0_4 = arith.constant 0 : index
    %c0_5 = arith.constant 0 : index
    %4 = vector.load %arg8[%c0_4, %c0_5] : memref<1x128xf32, #tpu.memory_space<vmem>>, vector<1x128xf32>
    %5 = vector.broadcast %4 : vector<1x128xf32> to vector<16x128xf32>
    %6 = arith.addf %3, %5 : vector<16x128xf32>
    %7 = arith.truncf %6 : vector<16x128xf32> to vector<16x128xbf16>
    %c0_6 = arith.constant 0 : index
    %c0_7 = arith.constant 0 : index
    %c0_8 = arith.constant 0 : index
    %8 = vector.load %arg2[%c0_6, %c0_7, %c0_8] : memref<1x16x128xbf16, #tpu.memory_space<vmem>>, vector<1x16x128xbf16>
    %9 = vector.shape_cast %8 : vector<1x16x128xbf16> to vector<16x128xbf16>
    %c0_9 = arith.constant 0 : index
    %c0_10 = arith.constant 0 : index
    %10 = vector.load %arg5[%c0_9, %c0_10] : memref<128x128xbf16, #tpu.memory_space<vmem>>, vector<128x128xbf16>
    %cst_11 = arith.constant dense<0.000000e+00> : vector<16x128xf32>
    %11 = tpu.matmul %9, %10, %cst_11 {dimension_numbers = #tpu.dot_dimension_numbers<[1], [0], [0], [1], [0, 0, 1, 1], [], []>} : vector<16x128xbf16>, vector<128x128xbf16>, vector<16x128xf32> -> vector<16x128xf32>
    %c0_12 = arith.constant 0 : index
    %c0_13 = arith.constant 0 : index
    %12 = vector.load %arg9[%c0_12, %c0_13] : memref<1x128xf32, #tpu.memory_space<vmem>>, vector<1x128xf32>
    %13 = vector.broadcast %12 : vector<1x128xf32> to vector<16x128xf32>
    %14 = arith.addf %11, %13 : vector<16x128xf32>
    %15 = arith.truncf %14 : vector<16x128xf32> to vector<16x128xbf16>
    %c0_14 = arith.constant 0 : index
    %c0_15 = arith.constant 0 : index
    %c0_16 = arith.constant 0 : index
    %16 = vector.load %arg3[%c0_14, %c0_15, %c0_16] : memref<1x16x128xbf16, #tpu.memory_space<vmem>>, vector<1x16x128xbf16>
    %17 = vector.shape_cast %16 : vector<1x16x128xbf16> to vector<16x128xbf16>
    %c0_17 = arith.constant 0 : index
    %c0_18 = arith.constant 0 : index
    %18 = vector.load %arg6[%c0_17, %c0_18] : memref<128x128xbf16, #tpu.memory_space<vmem>>, vector<128x128xbf16>
    %cst_19 = arith.constant dense<0.000000e+00> : vector<16x128xf32>
    %19 = tpu.matmul %17, %18, %cst_19 {dimension_numbers = #tpu.dot_dimension_numbers<[1], [0], [0], [1], [0, 0, 1, 1], [], []>} : vector<16x128xbf16>, vector<128x128xbf16>, vector<16x128xf32> -> vector<16x128xf32>
    %c0_20 = arith.constant 0 : index
    %c0_21 = arith.constant 0 : index
    %20 = vector.load %arg10[%c0_20, %c0_21] : memref<1x128xf32, #tpu.memory_space<vmem>>, vector<1x128xf32>
    %21 = vector.broadcast %20 : vector<1x128xf32> to vector<16x128xf32>
    %22 = arith.addf %19, %21 : vector<16x128xf32>
    %23 = arith.truncf %22 : vector<16x128xf32> to vector<16x128xbf16>
    %24 = vector.extract_strided_slice %7 {offsets = [0, 0], sizes = [16, 16], strides = [1, 1]} : vector<16x128xbf16> to vector<16x16xbf16>
    %25 = vector.extract_strided_slice %15 {offsets = [0, 0], sizes = [16, 16], strides = [1, 1]} : vector<16x128xbf16> to vector<16x16xbf16>
    %26 = vector.extract_strided_slice %23 {offsets = [0, 0], sizes = [16, 16], strides = [1, 1]} : vector<16x128xbf16> to vector<16x16xbf16>
    %cst_22 = arith.constant dense<0.000000e+00> : vector<16x16xf32>
    %27 = tpu.matmul %24, %25, %cst_22 {dimension_numbers = #tpu.dot_dimension_numbers<[1], [1], [0], [0], [0, 0, 1, 0], [], []>} : vector<16x16xbf16>, vector<16x16xbf16>, vector<16x16xf32> -> vector<16x16xf32>
    %cst_23 = arith.constant dense<0xFF800000> : vector<16xf32>
    %28 = vector.multi_reduction <maximumf>, %27, %cst_23 [1] : vector<16x16xf32> to vector<16xf32>
    %29 = vector.shape_cast %28 : vector<16xf32> to vector<16x1xf32>
    %30 = vector.broadcast %29 : vector<16x1xf32> to vector<16x16xf32>
    %31 = arith.subf %27, %30 : vector<16x16xf32>
    %32 = math.exp %31 : vector<16x16xf32>
    %cst_24 = arith.constant dense<0.000000e+00> : vector<16xf32>
    %33 = vector.multi_reduction <add>, %32, %cst_24 [1] : vector<16x16xf32> to vector<16xf32>
    %34 = vector.shape_cast %33 : vector<16xf32> to vector<16x1xf32>
    %35 = tpu.reciprocal %34 {approx = true} : vector<16x1xf32> -> vector<16x1xf32>
    %36 = vector.broadcast %35 : vector<16x1xf32> to vector<16x16xf32>
    %37 = arith.mulf %32, %36 : vector<16x16xf32>
    %38 = arith.truncf %37 : vector<16x16xf32> to vector<16x16xbf16>
    %cst_25 = arith.constant dense<0.000000e+00> : vector<16x16xf32>
    %39 = tpu.matmul %38, %26, %cst_25 {dimension_numbers = #tpu.dot_dimension_numbers<[1], [0], [0], [1], [0, 0, 1, 1], [], []>} : vector<16x16xbf16>, vector<16x16xbf16>, vector<16x16xf32> -> vector<16x16xf32>
    %40 = arith.truncf %39 : vector<16x16xf32> to vector<16x16xbf16>
    %c0_26 = arith.constant 0 : index
    %c0_27 = arith.constant 0 : index
    %41 = vector.load %arg13[%c0_26, %c0_27] : memref<16x128xbf16, #tpu.memory_space<vmem>>, vector<16x16xbf16>
    tpu.vector_store %arg13[%c0_26, %c0_27], %40 {strides = array<i32>} : memref<16x128xbf16, #tpu.memory_space<vmem>>, vector<16x16xbf16>,
    %42 = vector.extract_strided_slice %7 {offsets = [0, 16], sizes = [16, 16], strides = [1, 1]} : vector<16x128xbf16> to vector<16x16xbf16>
    %43 = vector.extract_strided_slice %15 {offsets = [0, 16], sizes = [16, 16], strides = [1, 1]} : vector<16x128xbf16> to vector<16x16xbf16>
    %44 = vector.extract_strided_slice %23 {offsets = [0, 16], sizes = [16, 16], strides = [1, 1]} : vector<16x128xbf16> to vector<16x16xbf16>
    %cst_28 = arith.constant dense<0.000000e+00> : vector<16x16xf32>
    %45 = tpu.matmul %42, %43, %cst_28 {dimension_numbers = #tpu.dot_dimension_numbers<[1], [1], [0], [0], [0, 0, 1, 0], [], []>} : vector<16x16xbf16>, vector<16x16xbf16>, vector<16x16xf32> -> vector<16x16xf32>
    %cst_29 = arith.constant dense<0xFF800000> : vector<16xf32>
    %46 = vector.multi_reduction <maximumf>, %45, %cst_29 [1] : vector<16x16xf32> to vector<16xf32>
    %47 = vector.shape_cast %46 : vector<16xf32> to vector<16x1xf32>
    %48 = vector.broadcast %47 : vector<16x1xf32> to vector<16x16xf32>
    %49 = arith.subf %45, %48 : vector<16x16xf32>
    %50 = math.exp %49 : vector<16x16xf32>
    %cst_30 = arith.constant dense<0.000000e+00> : vector<16xf32>
    %51 = vector.multi_reduction <add>, %50, %cst_30 [1] : vector<16x16xf32> to vector<16xf32>
    %52 = vector.shape_cast %51 : vector<16xf32> to vector<16x1xf32>
    %53 = tpu.reciprocal %52 {approx = true} : vector<16x1xf32> -> vector<16x1xf32>
    %54 = vector.broadcast %53 : vector<16x1xf32> to vector<16x16xf32>
    %55 = arith.mulf %50, %54 : vector<16x16xf32>
    %56 = arith.truncf %55 : vector<16x16xf32> to vector<16x16xbf16>
    %cst_31 = arith.constant dense<0.000000e+00> : vector<16x16xf32>
    %57 = tpu.matmul %56, %44, %cst_31 {dimension_numbers = #tpu.dot_dimension_numbers<[1], [0], [0], [1], [0, 0, 1, 1], [], []>} : vector<16x16xbf16>, vector<16x16xbf16>, vector<16x16xf32> -> vector<16x16xf32>
    %58 = arith.truncf %57 : vector<16x16xf32> to vector<16x16xbf16>
    %c0_32 = arith.constant 0 : index
    %c16 = arith.constant 16 : index
    %59 = vector.load %arg13[%c0_32, %c16] : memref<16x128xbf16, #tpu.memory_space<vmem>>, vector<16x16xbf16>
    tpu.vector_store %arg13[%c0_32, %c16], %58 {strides = array<i32>} : memref<16x128xbf16, #tpu.memory_space<vmem>>, vector<16x16xbf16>,
    %60 = vector.extract_strided_slice %7 {offsets = [0, 32], sizes = [16, 16], strides = [1, 1]} : vector<16x128xbf16> to vector<16x16xbf16>
    %61 = vector.extract_strided_slice %15 {offsets = [0, 32], sizes = [16, 16], strides = [1, 1]} : vector<16x128xbf16> to vector<16x16xbf16>
    %62 = vector.extract_strided_slice %23 {offsets = [0, 32], sizes = [16, 16], strides = [1, 1]} : vector<16x128xbf16> to vector<16x16xbf16>
    %cst_33 = arith.constant dense<0.000000e+00> : vector<16x16xf32>
    %63 = tpu.matmul %60, %61, %cst_33 {dimension_numbers = #tpu.dot_dimension_numbers<[1], [1], [0], [0], [0, 0, 1, 0], [], []>} : vector<16x16xbf16>, vector<16x16xbf16>, vector<16x16xf32> -> vector<16x16xf32>
    %cst_34 = arith.constant dense<0xFF800000> : vector<16xf32>
    %64 = vector.multi_reduction <maximumf>, %63, %cst_34 [1] : vector<16x16xf32> to vector<16xf32>
    %65 = vector.shape_cast %64 : vector<16xf32> to vector<16x1xf32>
    %66 = vector.broadcast %65 : vector<16x1xf32> to vector<16x16xf32>
    %67 = arith.subf %63, %66 : vector<16x16xf32>
    %68 = math.exp %67 : vector<16x16xf32>
    %cst_35 = arith.constant dense<0.000000e+00> : vector<16xf32>
    %69 = vector.multi_reduction <add>, %68, %cst_35 [1] : vector<16x16xf32> to vector<16xf32>
    %70 = vector.shape_cast %69 : vector<16xf32> to vector<16x1xf32>
    %71 = tpu.reciprocal %70 {approx = true} : vector<16x1xf32> -> vector<16x1xf32>
    %72 = vector.broadcast %71 : vector<16x1xf32> to vector<16x16xf32>
    %73 = arith.mulf %68, %72 : vector<16x16xf32>
    %74 = arith.truncf %73 : vector<16x16xf32> to vector<16x16xbf16>
    %cst_36 = arith.constant dense<0.000000e+00> : vector<16x16xf32>
    %75 = tpu.matmul %74, %62, %cst_36 {dimension_numbers = #tpu.dot_dimension_numbers<[1], [0], [0], [1], [0, 0, 1, 1], [], []>} : vector<16x16xbf16>, vector<16x16xbf16>, vector<16x16xf32> -> vector<16x16xf32>
    %76 = arith.truncf %75 : vector<16x16xf32> to vector<16x16xbf16>
    %c0_37 = arith.constant 0 : index
    %c32 = arith.constant 32 : index
    %77 = vector.load %arg13[%c0_37, %c32] : memref<16x128xbf16, #tpu.memory_space<vmem>>, vector<16x16xbf16>
    tpu.vector_store %arg13[%c0_37, %c32], %76 {strides = array<i32>} : memref<16x128xbf16, #tpu.memory_space<vmem>>, vector<16x16xbf16>,
    %78 = vector.extract_strided_slice %7 {offsets = [0, 48], sizes = [16, 16], strides = [1, 1]} : vector<16x128xbf16> to vector<16x16xbf16>
    %79 = vector.extract_strided_slice %15 {offsets = [0, 48], sizes = [16, 16], strides = [1, 1]} : vector<16x128xbf16> to vector<16x16xbf16>
    %80 = vector.extract_strided_slice %23 {offsets = [0, 48], sizes = [16, 16], strides = [1, 1]} : vector<16x128xbf16> to vector<16x16xbf16>
    %cst_38 = arith.constant dense<0.000000e+00> : vector<16x16xf32>
    %81 = tpu.matmul %78, %79, %cst_38 {dimension_numbers = #tpu.dot_dimension_numbers<[1], [1], [0], [0], [0, 0, 1, 0], [], []>} : vector<16x16xbf16>, vector<16x16xbf16>, vector<16x16xf32> -> vector<16x16xf32>
    %cst_39 = arith.constant dense<0xFF800000> : vector<16xf32>
    %82 = vector.multi_reduction <maximumf>, %81, %cst_39 [1] : vector<16x16xf32> to vector<16xf32>
    %83 = vector.shape_cast %82 : vector<16xf32> to vector<16x1xf32>
    %84 = vector.broadcast %83 : vector<16x1xf32> to vector<16x16xf32>
    %85 = arith.subf %81, %84 : vector<16x16xf32>
    %86 = math.exp %85 : vector<16x16xf32>
    %cst_40 = arith.constant dense<0.000000e+00> : vector<16xf32>
    %87 = vector.multi_reduction <add>, %86, %cst_40 [1] : vector<16x16xf32> to vector<16xf32>
    %88 = vector.shape_cast %87 : vector<16xf32> to vector<16x1xf32>
    %89 = tpu.reciprocal %88 {approx = true} : vector<16x1xf32> -> vector<16x1xf32>
    %90 = vector.broadcast %89 : vector<16x1xf32> to vector<16x16xf32>
    %91 = arith.mulf %86, %90 : vector<16x16xf32>
    %92 = arith.truncf %91 : vector<16x16xf32> to vector<16x16xbf16>
    %cst_41 = arith.constant dense<0.000000e+00> : vector<16x16xf32>
    %93 = tpu.matmul %92, %80, %cst_41 {dimension_numbers = #tpu.dot_dimension_numbers<[1], [0], [0], [1], [0, 0, 1, 1], [], []>} : vector<16x16xbf16>, vector<16x16xbf16>, vector<16x16xf32> -> vector<16x16xf32>
    %94 = arith.truncf %93 : vector<16x16xf32> to vector<16x16xbf16>
    %c0_42 = arith.constant 0 : index
    %c48 = arith.constant 48 : index
    %95 = vector.load %arg13[%c0_42, %c48] : memref<16x128xbf16, #tpu.memory_space<vmem>>, vector<16x16xbf16>
    tpu.vector_store %arg13[%c0_42, %c48], %94 {strides = array<i32>} : memref<16x128xbf16, #tpu.memory_space<vmem>>, vector<16x16xbf16>,
    %96 = vector.extract_strided_slice %7 {offsets = [0, 64], sizes = [16, 16], strides = [1, 1]} : vector<16x128xbf16> to vector<16x16xbf16>
    %97 = vector.extract_strided_slice %15 {offsets = [0, 64], sizes = [16, 16], strides = [1, 1]} : vector<16x128xbf16> to vector<16x16xbf16>
    %98 = vector.extract_strided_slice %23 {offsets = [0, 64], sizes = [16, 16], strides = [1, 1]} : vector<16x128xbf16> to vector<16x16xbf16>
    %cst_43 = arith.constant dense<0.000000e+00> : vector<16x16xf32>
    %99 = tpu.matmul %96, %97, %cst_43 {dimension_numbers = #tpu.dot_dimension_numbers<[1], [1], [0], [0], [0, 0, 1, 0], [], []>} : vector<16x16xbf16>, vector<16x16xbf16>, vector<16x16xf32> -> vector<16x16xf32>
    %cst_44 = arith.constant dense<0xFF800000> : vector<16xf32>
    %100 = vector.multi_reduction <maximumf>, %99, %cst_44 [1] : vector<16x16xf32> to vector<16xf32>
    %101 = vector.shape_cast %100 : vector<16xf32> to vector<16x1xf32>
    %102 = vector.broadcast %101 : vector<16x1xf32> to vector<16x16xf32>
    %103 = arith.subf %99, %102 : vector<16x16xf32>
    %104 = math.exp %103 : vector<16x16xf32>
    %cst_45 = arith.constant dense<0.000000e+00> : vector<16xf32>
    %105 = vector.multi_reduction <add>, %104, %cst_45 [1] : vector<16x16xf32> to vector<16xf32>
    %106 = vector.shape_cast %105 : vector<16xf32> to vector<16x1xf32>
    %107 = tpu.reciprocal %106 {approx = true} : vector<16x1xf32> -> vector<16x1xf32>
    %108 = vector.broadcast %107 : vector<16x1xf32> to vector<16x16xf32>
    %109 = arith.mulf %104, %108 : vector<16x16xf32>
    %110 = arith.truncf %109 : vector<16x16xf32> to vector<16x16xbf16>
    %cst_46 = arith.constant dense<0.000000e+00> : vector<16x16xf32>
    %111 = tpu.matmul %110, %98, %cst_46 {dimension_numbers = #tpu.dot_dimension_numbers<[1], [0], [0], [1], [0, 0, 1, 1], [], []>} : vector<16x16xbf16>, vector<16x16xbf16>, vector<16x16xf32> -> vector<16x16xf32>
    %112 = arith.truncf %111 : vector<16x16xf32> to vector<16x16xbf16>
    %c0_47 = arith.constant 0 : index
    %c64 = arith.constant 64 : index
    %113 = vector.load %arg13[%c0_47, %c64] : memref<16x128xbf16, #tpu.memory_space<vmem>>, vector<16x16xbf16>
    tpu.vector_store %arg13[%c0_47, %c64], %112 {strides = array<i32>} : memref<16x128xbf16, #tpu.memory_space<vmem>>, vector<16x16xbf16>,
    %114 = vector.extract_strided_slice %7 {offsets = [0, 80], sizes = [16, 16], strides = [1, 1]} : vector<16x128xbf16> to vector<16x16xbf16>
    %115 = vector.extract_strided_slice %15 {offsets = [0, 80], sizes = [16, 16], strides = [1, 1]} : vector<16x128xbf16> to vector<16x16xbf16>
    %116 = vector.extract_strided_slice %23 {offsets = [0, 80], sizes = [16, 16], strides = [1, 1]} : vector<16x128xbf16> to vector<16x16xbf16>
    %cst_48 = arith.constant dense<0.000000e+00> : vector<16x16xf32>
    %117 = tpu.matmul %114, %115, %cst_48 {dimension_numbers = #tpu.dot_dimension_numbers<[1], [1], [0], [0], [0, 0, 1, 0], [], []>} : vector<16x16xbf16>, vector<16x16xbf16>, vector<16x16xf32> -> vector<16x16xf32>
    %cst_49 = arith.constant dense<0xFF800000> : vector<16xf32>
    %118 = vector.multi_reduction <maximumf>, %117, %cst_49 [1] : vector<16x16xf32> to vector<16xf32>
    %119 = vector.shape_cast %118 : vector<16xf32> to vector<16x1xf32>
    %120 = vector.broadcast %119 : vector<16x1xf32> to vector<16x16xf32>
    %121 = arith.subf %117, %120 : vector<16x16xf32>
    %122 = math.exp %121 : vector<16x16xf32>
    %cst_50 = arith.constant dense<0.000000e+00> : vector<16xf32>
    %123 = vector.multi_reduction <add>, %122, %cst_50 [1] : vector<16x16xf32> to vector<16xf32>
    %124 = vector.shape_cast %123 : vector<16xf32> to vector<16x1xf32>
    %125 = tpu.reciprocal %124 {approx = true} : vector<16x1xf32> -> vector<16x1xf32>
    %126 = vector.broadcast %125 : vector<16x1xf32> to vector<16x16xf32>
    %127 = arith.mulf %122, %126 : vector<16x16xf32>
    %128 = arith.truncf %127 : vector<16x16xf32> to vector<16x16xbf16>
    %cst_51 = arith.constant dense<0.000000e+00> : vector<16x16xf32>
    %129 = tpu.matmul %128, %116, %cst_51 {dimension_numbers = #tpu.dot_dimension_numbers<[1], [0], [0], [1], [0, 0, 1, 1], [], []>} : vector<16x16xbf16>, vector<16x16xbf16>, vector<16x16xf32> -> vector<16x16xf32>
    %130 = arith.truncf %129 : vector<16x16xf32> to vector<16x16xbf16>
    %c0_52 = arith.constant 0 : index
    %c80 = arith.constant 80 : index
    %131 = vector.load %arg13[%c0_52, %c80] : memref<16x128xbf16, #tpu.memory_space<vmem>>, vector<16x16xbf16>
    tpu.vector_store %arg13[%c0_52, %c80], %130 {strides = array<i32>} : memref<16x128xbf16, #tpu.memory_space<vmem>>, vector<16x16xbf16>,
    %132 = vector.extract_strided_slice %7 {offsets = [0, 96], sizes = [16, 16], strides = [1, 1]} : vector<16x128xbf16> to vector<16x16xbf16>
    %133 = vector.extract_strided_slice %15 {offsets = [0, 96], sizes = [16, 16], strides = [1, 1]} : vector<16x128xbf16> to vector<16x16xbf16>
    %134 = vector.extract_strided_slice %23 {offsets = [0, 96], sizes = [16, 16], strides = [1, 1]} : vector<16x128xbf16> to vector<16x16xbf16>
    %cst_53 = arith.constant dense<0.000000e+00> : vector<16x16xf32>
    %135 = tpu.matmul %132, %133, %cst_53 {dimension_numbers = #tpu.dot_dimension_numbers<[1], [1], [0], [0], [0, 0, 1, 0], [], []>} : vector<16x16xbf16>, vector<16x16xbf16>, vector<16x16xf32> -> vector<16x16xf32>
    %cst_54 = arith.constant dense<0xFF800000> : vector<16xf32>
    %136 = vector.multi_reduction <maximumf>, %135, %cst_54 [1] : vector<16x16xf32> to vector<16xf32>
    %137 = vector.shape_cast %136 : vector<16xf32> to vector<16x1xf32>
    %138 = vector.broadcast %137 : vector<16x1xf32> to vector<16x16xf32>
    %139 = arith.subf %135, %138 : vector<16x16xf32>
    %140 = math.exp %139 : vector<16x16xf32>
    %cst_55 = arith.constant dense<0.000000e+00> : vector<16xf32>
    %141 = vector.multi_reduction <add>, %140, %cst_55 [1] : vector<16x16xf32> to vector<16xf32>
    %142 = vector.shape_cast %141 : vector<16xf32> to vector<16x1xf32>
    %143 = tpu.reciprocal %142 {approx = true} : vector<16x1xf32> -> vector<16x1xf32>
    %144 = vector.broadcast %143 : vector<16x1xf32> to vector<16x16xf32>
    %145 = arith.mulf %140, %144 : vector<16x16xf32>
    %146 = arith.truncf %145 : vector<16x16xf32> to vector<16x16xbf16>
    %cst_56 = arith.constant dense<0.000000e+00> : vector<16x16xf32>
    %147 = tpu.matmul %146, %134, %cst_56 {dimension_numbers = #tpu.dot_dimension_numbers<[1], [0], [0], [1], [0, 0, 1, 1], [], []>} : vector<16x16xbf16>, vector<16x16xbf16>, vector<16x16xf32> -> vector<16x16xf32>
    %148 = arith.truncf %147 : vector<16x16xf32> to vector<16x16xbf16>
    %c0_57 = arith.constant 0 : index
    %c96 = arith.constant 96 : index
    %149 = vector.load %arg13[%c0_57, %c96] : memref<16x128xbf16, #tpu.memory_space<vmem>>, vector<16x16xbf16>
    tpu.vector_store %arg13[%c0_57, %c96], %148 {strides = array<i32>} : memref<16x128xbf16, #tpu.memory_space<vmem>>, vector<16x16xbf16>,
    %150 = vector.extract_strided_slice %7 {offsets = [0, 112], sizes = [16, 16], strides = [1, 1]} : vector<16x128xbf16> to vector<16x16xbf16>
    %151 = vector.extract_strided_slice %15 {offsets = [0, 112], sizes = [16, 16], strides = [1, 1]} : vector<16x128xbf16> to vector<16x16xbf16>
    %152 = vector.extract_strided_slice %23 {offsets = [0, 112], sizes = [16, 16], strides = [1, 1]} : vector<16x128xbf16> to vector<16x16xbf16>
    %cst_58 = arith.constant dense<0.000000e+00> : vector<16x16xf32>
    %153 = tpu.matmul %150, %151, %cst_58 {dimension_numbers = #tpu.dot_dimension_numbers<[1], [1], [0], [0], [0, 0, 1, 0], [], []>} : vector<16x16xbf16>, vector<16x16xbf16>, vector<16x16xf32> -> vector<16x16xf32>
    %cst_59 = arith.constant dense<0xFF800000> : vector<16xf32>
    %154 = vector.multi_reduction <maximumf>, %153, %cst_59 [1] : vector<16x16xf32> to vector<16xf32>
    %155 = vector.shape_cast %154 : vector<16xf32> to vector<16x1xf32>
    %156 = vector.broadcast %155 : vector<16x1xf32> to vector<16x16xf32>
    %157 = arith.subf %153, %156 : vector<16x16xf32>
    %158 = math.exp %157 : vector<16x16xf32>
    %cst_60 = arith.constant dense<0.000000e+00> : vector<16xf32>
    %159 = vector.multi_reduction <add>, %158, %cst_60 [1] : vector<16x16xf32> to vector<16xf32>
    %160 = vector.shape_cast %159 : vector<16xf32> to vector<16x1xf32>
    %161 = tpu.reciprocal %160 {approx = true} : vector<16x1xf32> -> vector<16x1xf32>
    %162 = vector.broadcast %161 : vector<16x1xf32> to vector<16x16xf32>
    %163 = arith.mulf %158, %162 : vector<16x16xf32>
    %164 = arith.truncf %163 : vector<16x16xf32> to vector<16x16xbf16>
    %cst_61 = arith.constant dense<0.000000e+00> : vector<16x16xf32>
    %165 = tpu.matmul %164, %152, %cst_61 {dimension_numbers = #tpu.dot_dimension_numbers<[1], [0], [0], [1], [0, 0, 1, 1], [], []>} : vector<16x16xbf16>, vector<16x16xbf16>, vector<16x16xf32> -> vector<16x16xf32>
    %166 = arith.truncf %165 : vector<16x16xf32> to vector<16x16xbf16>
    %c0_62 = arith.constant 0 : index
    %c112 = arith.constant 112 : index
    %167 = vector.load %arg13[%c0_62, %c112] : memref<16x128xbf16, #tpu.memory_space<vmem>>, vector<16x16xbf16>
    tpu.vector_store %arg13[%c0_62, %c112], %166 {strides = array<i32>} : memref<16x128xbf16, #tpu.memory_space<vmem>>, vector<16x16xbf16>,
    %c0_63 = arith.constant 0 : index
    %c0_64 = arith.constant 0 : index
    %168 = vector.load %arg13[%c0_63, %c0_64] : memref<16x128xbf16, #tpu.memory_space<vmem>>, vector<16x128xbf16>
    %c0_65 = arith.constant 0 : index
    %c0_66 = arith.constant 0 : index
    %169 = vector.load %arg7[%c0_65, %c0_66] : memref<128x128xbf16, #tpu.memory_space<vmem>>, vector<128x128xbf16>
    %cst_67 = arith.constant dense<0.000000e+00> : vector<16x128xf32>
    %170 = tpu.matmul %168, %169, %cst_67 {dimension_numbers = #tpu.dot_dimension_numbers<[1], [0], [0], [1], [0, 0, 1, 1], [], []>} : vector<16x128xbf16>, vector<128x128xbf16>, vector<16x128xf32> -> vector<16x128xf32>
    %c0_68 = arith.constant 0 : index
    %c0_69 = arith.constant 0 : index
    %171 = vector.load %arg11[%c0_68, %c0_69] : memref<1x128xf32, #tpu.memory_space<vmem>>, vector<1x128xf32>
    %172 = vector.broadcast %171 : vector<1x128xf32> to vector<16x128xf32>
    %173 = arith.addf %170, %172 : vector<16x128xf32>
    %c0_70 = arith.constant 0 : index
    %c0_71 = arith.constant 0 : index
    %c0_72 = arith.constant 0 : index
    %174 = vector.load %arg12[%c0_70, %c0_71, %c0_72] : memref<1x16x128xf32, #tpu.memory_space<vmem>>, vector<1x16x128xf32>
    %175 = vector.shape_cast %174 : vector<1x16x128xf32> to vector<16x128xf32>
    %176 = vector.shape_cast %173 : vector<16x128xf32> to vector<1x16x128xf32>
    tpu.vector_store %arg12[%c0_70, %c0_71, %c0_72], %176 {strides = array<i32>} : memref<1x16x128xf32, #tpu.memory_space<vmem>>, vector<1x16x128xf32>,
    return
  }
  func.func @transform_0(%arg0: i32) -> (i32, i32, i32) {
    %c0_i32 = arith.constant 0 : i32
    %c0_i32_0 = arith.constant 0 : i32
    %c0_i32_1 = arith.constant 0 : i32
    return %arg0, %c0_i32, %c0_i32_0 : i32, i32, i32
  }
  func.func @transform_1(%arg0: i32) -> (i32, i32, i32) {
    %c0_i32 = arith.constant 0 : i32
    %c0_i32_0 = arith.constant 0 : i32
    %c0_i32_1 = arith.constant 0 : i32
    return %arg0, %c0_i32, %c0_i32_0 : i32, i32, i32
  }
  func.func @transform_2(%arg0: i32) -> (i32, i32, i32) {
    %c0_i32 = arith.constant 0 : i32
    %c0_i32_0 = arith.constant 0 : i32
    %c0_i32_1 = arith.constant 0 : i32
    return %arg0, %c0_i32, %c0_i32_0 : i32, i32, i32
  }
  func.func @transform_3(%arg0: i32) -> (i32, i32) {
    %c0_i32 = arith.constant 0 : i32
    %c0_i32_0 = arith.constant 0 : i32
    %c0_i32_1 = arith.constant 0 : i32
    return %c0_i32, %c0_i32_0 : i32, i32
  }
  func.func @transform_4(%arg0: i32) -> (i32, i32) {
    %c0_i32 = arith.constant 0 : i32
    %c0_i32_0 = arith.constant 0 : i32
    %c0_i32_1 = arith.constant 0 : i32
    return %c0_i32, %c0_i32_0 : i32, i32
  }
  func.func @transform_5(%arg0: i32) -> (i32, i32) {
    %c0_i32 = arith.constant 0 : i32
    %c0_i32_0 = arith.constant 0 : i32
    %c0_i32_1 = arith.constant 0 : i32
    return %c0_i32, %c0_i32_0 : i32, i32
  }
  func.func @transform_6(%arg0: i32) -> (i32, i32) {
    %c0_i32 = arith.constant 0 : i32
    %c0_i32_0 = arith.constant 0 : i32
    %c0_i32_1 = arith.constant 0 : i32
    return %c0_i32, %c0_i32_0 : i32, i32
  }
  func.func @transform_7(%arg0: i32) -> (i32, i32) {
    %c0_i32 = arith.constant 0 : i32
    %c0_i32_0 = arith.constant 0 : i32
    %c0_i32_1 = arith.constant 0 : i32
    return %c0_i32, %c0_i32_0 : i32, i32
  }
  func.func @transform_8(%arg0: i32) -> (i32, i32) {
    %c0_i32 = arith.constant 0 : i32
    %c0_i32_0 = arith.constant 0 : i32
    %c0_i32_1 = arith.constant 0 : i32
    return %c0_i32, %c0_i32_0 : i32, i32
  }
  func.func @transform_9(%arg0: i32) -> (i32, i32) {
    %c0_i32 = arith.constant 0 : i32
    %c0_i32_0 = arith.constant 0 : i32
    %c0_i32_1 = arith.constant 0 : i32
    return %c0_i32, %c0_i32_0 : i32, i32
  }
  func.func @transform_10(%arg0: i32) -> (i32, i32) {
    %c0_i32 = arith.constant 0 : i32
    %c0_i32_0 = arith.constant 0 : i32
    %c0_i32_1 = arith.constant 0 : i32
    return %c0_i32, %c0_i32_0 : i32, i32
  }
  func.func @transform_11(%arg0: i32) -> (i32, i32, i32) {
    %c0_i32 = arith.constant 0 : i32
    %c0_i32_0 = arith.constant 0 : i32
    %c0_i32_1 = arith.constant 0 : i32
    return %arg0, %c0_i32, %c0_i32_0 : i32, i32, i32
  }
}

</mosaic_0001>

<bundles_post_ra>
// kernel: tpu_custom_call.1
= control target key start
LH: loop header
LB: loop body
LE: loop exit
PB: predicated region body
PF: predicated region fallthrough
CT: control target
= control target key end

     0   :  { %s3010_s0 = inlined_call_operand.hbm [shape: bf16[2,16,128], index: 0, kind: input, shape index: {}]   ;;  %s3011_s1 = inlined_call_operand.hbm [shape: bf16[2,16,128], index: 1, kind: input, shape index: {}]   ;;  %s3012_s2 = inlined_call_operand.hbm [shape: bf16[2,16,128], index: 2, kind: input, shape index: {}]   ;;  %s3013_s3 = inlined_call_operand.hbm [shape: bf16[128,128], index: 3, kind: input, shape index: {}]   ;;  %s3014_s4 = inlined_call_operand.hbm [shape: bf16[128,128], index: 4, kind: input, shape index: {}]   ;;  %s3015_s5 = inlined_call_operand.hbm [shape: bf16[128,128], index: 5, kind: input, shape index: {}]   ;;  %s3016_s6 = inlined_call_operand.hbm [shape: bf16[128,128], index: 6, kind: input, shape index: {}]   ;;  %s3017_s7 = inlined_call_operand.vmem [shape: f32[1,128], index: 7, kind: input, shape index: {}]   ;;  %s3018_s8 = inlined_call_operand.vmem [shape: f32[1,128], index: 8, kind: input, shape index: {}]   ;;  %s3019_s9 = inlined_call_operand.vmem [shape: f32[1,128], index: 9, kind: input, shape index: {}]   ;;  %s3020_s10 = inlined_call_operand.vmem [shape: f32[1,128], index: 10, kind: input, shape index: {}]   ;;  %s3021_s11 = inlined_call_operand.hbm [shape: f32[2,16,128], index: 11, kind: output, shape index: {}]  }
   0x1   :  { %3034 = sst [smem:[#allocation26_spill]] %s3011_s1 }
   0x2   :  { %3035 = sst [smem:[#allocation27_spill]] %s3013_s3 }
   0x3   :  { %3036 = sst [smem:[#allocation28_spill]] %s3014_s4 }
   0x4   :  { %3037 = sst [smem:[#allocation29_spill]] %s3015_s5 }
   0x5   :  { %3038 = sst [smem:[#allocation30_spill]] %s3016_s6 }
   0x6   :  { %3039 = sst [smem:[#allocation31_spill]] %s3021_s11 }
   0x7   :  { %16 = vsyncpa [#allocation4], 0 }
   0x8   :  { %18 = vsyncpa [#allocation4 + $0x1], 0 }
   0x9   :  { %19 = vsyncpa [#allocation7], 0 }
   0xa   :  { %21 = vsyncpa [#allocation7 + $0x1], 0 }
   0xb   :  { %22 = vsyncpa [#allocation10], 0 }
   0xc   :  { %23 = vsyncpa [#allocation13], 0 }
   0xd   :  { %24 = vsyncpa [#allocation5], 0 }
   0xe   :  { %26 = vsyncpa [#allocation5 + $0x1], 0  ;;  %s2506_s17 = smov 0   ;;  %s2508_s18 = smov 0  }
   0xf   :  { %s2510_s19 = smov 0   ;;  %s2512_s20 = smov 0  }
  0x10 LB: > { %3040 = sst [smem:[#allocation21_spill]] %s2417_s17  ;;  %s2527_s21 = sadd.s32 4294967295, %s2429_s20   ;;  %s2429_s20 = sphi %s2512_s20, %s3068_s20   ;;  %s2425_s19 = sphi %s2510_s19, %s3072_s19   ;;  %s2421_s18 = sphi %s2508_s18, %s3071_s18   ;;  %s2417_s17 = sphi %s2506_s17, %s3070_s17  }
  0x11   : > { %3041 = sst [smem:[#allocation22_spill]] %s2429_s20  ;;  %s1735_s22 = sadd.s32 4294967294, %s2429_s20  }
  0x12   : > { %p52_p0 = scmp.ne.s32.totalorder %s2421_s18, %s2417_s17  ;;  %p3032_p1 = scmp.eq.s32.totalorder %s2527_s21, 0 }
  0x13   : > { %p296_p2 = scmp.eq.s32.totalorder %s2527_s21, 1  ;;  %p302_p3 = scmp.eq.s32.totalorder %s1735_s22, 1 }
  0x14   : > { %p2536_p4 = por %p3032_p1, %p52_p0  ;;  %p1736_p5 = scmp.ge.s32.totalorder %s2429_s20, 1 }
  0x15   : > { %p2541_p6 = por %p302_p3, %p52_p0  ;;  %p309_p7 = scmp.lt.s32.totalorder %s2429_s20, 3 }
  0x16   : > { %s3045_s3 = sld [smem:[#allocation27_spill]]  ;;  %s2431_s29 = smov [#allocation9]  }
  0x17   : > { %s3043_s24 = scalar_select %p2541_p6, 1, 0 }
  0x18   : > { %p2549_p8 = pnand %p1736_p5, %p309_p7  ;;  %s322_s30 = sshll.u32 %s2431_s29, 4  ;;  %s323_s30 = int_to_ptr.vmem [resolvable:$true] %s322_s30 }
  0x19   : > { %3044 = sst [smem:[#allocation23_spill]] %s3043_s24  ;;  %s3022_s16 = smov 64  }
  0x1a   : > { %p1989_p9 = pneg %p2549_p8  ;;  %s3048_s5 = sld [smem:[#allocation29_spill]] }
  0x1b   : > { %s3024_s22 = smov 4   ;;  %s2434_s25 = smov [#allocation12]  }
  0x1c   : > { %s320_s27 = sshll.u32 %s3045_s3, 4  ;;  %p2557_p10 = pnand %p1989_p9, %p3032_p1  ;;  %s321_s27 = int_to_ptr.hbm [resolvable:$true] %s320_s27 }
  0x1d   : > { %s350_s26 = sshll.u32 %s2434_s25, 4  ;;  %s2576_s29 = sadd.s32 1, %s2429_s20   ;;  %s351_s26 = int_to_ptr.vmem [resolvable:$true] %s350_s26 }
  0x1e   : > { %1992 = dma.hbm_to_vmem [thread:$0]  (!%p2557_p10), %s321_s27, 1024, %s323_s30, [#allocation10], %s3022_s16, %s3022_s16, %s3024_s22  }
  0x1f   : > { %3049 = sst [smem:[#allocation24_spill]] %s2576_s29  ;;  %s39_s13 = sadd.s32 1, %s2425_s19 }
  0x20   : > { %s348_s15 = sshll.u32 %s3048_s5, 4  ;;  %s36_s14 = ssub.s32 %s2429_s20, %s2576_s29  ;;  %s349_s15 = int_to_ptr.hbm [resolvable:$true] %s348_s15 }
  0x21   : > { %1998 = dma.hbm_to_vmem [thread:$0]  (!%p2557_p10), %s349_s15, 1024, %s351_s26, [#allocation13], %s3022_s16, %s3022_s16, %s3024_s22  }
  0x22   : > { %p46_p12 = scmp.ne.s32.totalorder %s2425_s19, %s2421_s18  ;;  %p37_p13 = scmp.eq.s32.totalorder %s36_s14, 0 }
  0x23   : > { %p47_p0 = scmp.eq.s32.totalorder %s2429_s20, 0  ;;  %p2020_p5 = scmp.lt.s32.totalorder %s2429_s20, 2 }
  0x24   : > { %p2586_p3 = por %p296_p2, %p46_p12  ;;  %s3028_s25 = sand.u32 1, %s2425_s19  }
  0x25   : > { %s2592_s30 = scalar_select %p37_p13, %s2425_s19, %s39_s13  }
  0x26   : > { %p48_p7 = por %p47_p0, %p46_p12  ;;  %s2597_s15 = sshll.u32 %s3028_s25, 3 }
  0x27   : > { %3051 = sst [smem:[#allocation25_spill]] %s2592_s30  ;;  %s2600_s26 = sshll.u32 %s2429_s20, 3 }
  0x28   : > { %p2602_p9 = pnand %p2020_p5, %p48_p7  ;;  %s412_s16 = sand.u32 1, %s2429_s20  }
  0x29   : > { %s3053_s1 = sld [smem:[#allocation26_spill]]  ;;  %s416_s30 = scalar_lea.vmem [#allocation6], %s2597_s15 }
  0x2a   : > { %s424_s29 = sshll.u32 %s416_s30, 4  ;;  %s2612_s25 = scalar_lea.sflag [#allocation7], %s412_s16  ;;  %s425_s29 = int_to_ptr.vmem [resolvable:$true] %s424_s29 }
  0x2b   : > { %p2205_p12 = pneg %p2602_p9 }
  0x2f   : > { %s421_s13 = scalar_lea.hbm %s3053_s1, %s2600_s26  ;;  %s2208_s22 = scalar_lea.hbm %s3053_s1, 16 }
  0x30   : > { %s422_s5 = sshll.u32 %s421_s13, 4  ;;  %s423_s5 = int_to_ptr.hbm [resolvable:$true] %s422_s5 }
  0x31   : > { %s2201_s24 = sshra.s32 %s423_s5, 4  ;;  %s2202_s24 = int_to_ptr.hbm [resolvable:$true] %s2201_s24 }
  0x32   : > { %s2203_s17 = scalar_lea.hbm %s2202_s24, 8  ;;  %p2209_p5 = scmp.lt.s32.totalorder %s2202_s24, %s3053_s1 }
  0x33   : > { %p2204_p2 = scmp.ne.s32.totalorder %s2202_s24, %s2203_s17  ;;  %p2210_p7 = scmp.lt.s32.totalorder %s2208_s22, %s2203_s17 }
  0x35   : > { %p2206_p13 = pnand %p2205_p12, %p2204_p2  ;;  %p2211_p11 = por %p2210_p7, %p2209_p5 }
  0x37   : > { %p2207_p0 = pneg %p2206_p13 }
  0x39   : > { %p2212_p1 = pnand %p2211_p11, %p2207_p0 }
  0x3b   : > { %2215 = shalt.err (!%p2212_p1)
}
  0x3c   : > { %s3054_s16 = smov 4   ;;  %s3055_s11 = smov 64  }
  0x3d   : > { %2008 = dma.hbm_to_vmem [thread:$0]  (!%p2602_p9), %s423_s5, 128, %s425_s29, %s2612_s25, %s3055_s11, %s3055_s11, %s3054_s16  }
  0x3e   : > { %s3056_s4 = sld [smem:[#allocation28_spill]]  ;;  %s2435_s17 = smov [#allocation11]  }
  0x3f   : > { %s336_s24 = sshll.u32 %s2435_s17, 4  ;;  %s3057_s6 = sld [smem:[#allocation30_spill]]  ;;  %s337_s24 = int_to_ptr.vmem [resolvable:$true] %s336_s24 }
  0x40   : > { %s2436_s5 = smov [#allocation14]   ;;  %s399_s17 = scalar_lea.hbm %s3010_s0, %s2600_s26 }
  0x41   : > { %s364_s29 = sshll.u32 %s2436_s5, 4  ;;  %s394_s22 = scalar_lea.vmem [#allocation3], %s2597_s15  ;;  %s365_s29 = int_to_ptr.vmem [resolvable:$true] %s364_s29 }
  0x42   : > { %s402_s30 = sshll.u32 %s394_s22, 4  ;;  %s403_s30 = int_to_ptr.vmem [resolvable:$true] %s402_s30 }
  0x44   : > { %s334_s13 = sshll.u32 %s3056_s4, 4  ;;  %s400_s4 = sshll.u32 %s399_s17, 4  ;;  %s335_s13 = int_to_ptr.hbm [resolvable:$true] %s334_s13  ;;  %s401_s4 = int_to_ptr.hbm [resolvable:$true] %s400_s4 }
  0x45   : > { %s362_s1 = sshll.u32 %s3057_s6, 4  ;;  %s2291_s6 = sshra.s32 %s401_s4, 4  ;;  %s363_s1 = int_to_ptr.hbm [resolvable:$true] %s362_s1  ;;  %s2292_s6 = int_to_ptr.hbm [resolvable:$true] %s2291_s6 }
  0x46   : > { %1995 = dma.hbm_to_vmem [thread:$0]  (!%p2557_p10), %s335_s13, 1024, %s337_s24, [#allocation10], %s3055_s11, %s3055_s11, %s3054_s16  }
  0x47   : > { %2001 = dma.hbm_to_vmem [thread:$0]  (!%p2557_p10), %s363_s1, 1024, %s365_s29, [#allocation13], %s3055_s11, %s3055_s11, %s3054_s16  }
  0x48   : > { %s3058_s13 = sand.u32 1, %s2425_s19   ;;  %s2293_s5 = scalar_lea.hbm %s2292_s6, 8 }
  0x49   : > { %s391_s24 = scalar_lea.sflag [#allocation4], %s3058_s13  ;;  %p2294_p1 = scmp.ne.s32.totalorder %s2292_s6, %s2293_s5 }
  0x4a   : > { %s2298_s29 = scalar_lea.hbm %s3010_s0, 16  ;;  %p2299_p10 = scmp.lt.s32.totalorder %s2292_s6, %s3010_s0 }
  0x4b   : > { %p2296_p11 = pnand %p2294_p1, %p2205_p12  ;;  %p2300_p13 = scmp.lt.s32.totalorder %s2298_s29, %s2293_s5 }
  0x4d   : > { %p2297_p2 = pneg %p2296_p11  ;;  %p2301_p0 = por %p2300_p13, %p2299_p10 }
  0x4f   : > { %p2302_p5 = pnand %p2301_p0, %p2297_p2 }
  0x51   : > { %2305 = shalt.err (!%p2302_p5)
}
  0x52   : > { %2005 = dma.hbm_to_vmem [thread:$0]  (!%p2602_p9), %s401_s4, 128, %s403_s30, %s391_s24, %s3055_s11, %s3055_s11, %s3054_s16  }
  0x53   : > { %s443_s13 = scalar_lea.hbm %s3012_s2, %s2600_s26  ;;  %s438_s1 = scalar_lea.vmem [#allocation8], %s2597_s15 }
  0x54   : > { %s446_s12 = sshll.u32 %s438_s1, 4  ;;  %s444_s6 = sshll.u32 %s443_s13, 4  ;;  %s447_s12 = int_to_ptr.vmem [resolvable:$true] %s446_s12  ;;  %s445_s6 = int_to_ptr.hbm [resolvable:$true] %s444_s6 }
  0x55   : > { %s2321_s5 = sshra.s32 %s445_s6, 4  ;;  %s2328_s4 = scalar_lea.hbm %s3012_s2, 16  ;;  %s2322_s5 = int_to_ptr.hbm [resolvable:$true] %s2321_s5 }
  0x56   : > { %s2323_s29 = scalar_lea.hbm %s2322_s5, 8  ;;  %p2329_p2 = scmp.lt.s32.totalorder %s2322_s5, %s3012_s2 }
  0x57   : > { %p2324_p7 = scmp.ne.s32.totalorder %s2322_s5, %s2323_s29  ;;  %p2330_p10 = scmp.lt.s32.totalorder %s2328_s4, %s2323_s29 }
  0x59   : > { %p2326_p1 = pnand %p2324_p7, %p2205_p12  ;;  %p2331_p13 = por %p2330_p10, %p2329_p2 }
  0x5b   : > { %p2327_p11 = pneg %p2326_p1 }
  0x5d   : > { %p2332_p0 = pnand %p2331_p13, %p2327_p11 }
  0x5f   : > { %2335 = shalt.err (!%p2332_p0)
}
  0x60   : > { %2011 = dma.hbm_to_vmem [thread:$0]  (!%p2602_p9), %s445_s6, 128, %s447_s12, %s2612_s25, %s3055_s11, %s3055_s11, %s3054_s16  }
  0x61   : > { %458 = sbr.rel (%p2549_p8) target bundleno = 1638 (0x666), region = 64  ;;  %s2691_s15 = sand.u32 (!%p2549_p8), 1, %s2421_s18  }
  0x62   : > { %s2694_s26 = sshll.u32 (!%p2549_p8), %s2691_s15, 3  ;;  %s461_s17 = scalar_lea.sflag (!%p2549_p8), [#allocation4], %s2691_s15 }
  0x63   : > { %s464_s22 = scalar_lea.vmem (!%p2549_p8), [#allocation3], %s2694_s26 }
  0x66   : > { %2396 = dma.done.wait (%p2536_p4), %s461_s17, 128  }
  0x67   : > { %2398 = vsyncadd (%p2536_p4), %s461_s17, 4294967168  ;;  %s470_s11 = sand.u32 1, %s2527_s21   ;;  %s474_s25 = scalar_lea.vmem [#allocation6], %s2694_s26 }
  0x68   : > { %s471_s28 = scalar_lea.sflag [#allocation7], %s470_s11 }
  0x69   : > { %2400 = dma.done.wait (%p2536_p4), %s471_s28, 256  }
  0x6a   : > { %2402 = vsyncadd (%p2536_p4), %s471_s28, 4294967040  ;;  %s484_s14 = scalar_lea.vmem [#allocation8], %s2694_s26  ;;  %p3059_p8 = scmp.eq.s32.totalorder %s2527_s21, 0 }
  0x6c   : > { %2404 = dma.done.wait (%p3059_p8), [#allocation10], 2048   ;;  %p3060_p9 = pmov %p3059_p8 }
  0x6d   : > { %p3061_p12 = pmov %p3059_p8 }
  0x6e   : > { %2406 = vsyncadd (%p3060_p9), [#allocation10], 4294965248 }
  0x6f   : > { %2408 = dma.done.wait (%p3061_p12), [#allocation13], 2048   ;;  %p3062_p5 = pmov %p3059_p8 }
  0x70   : > { %v1936_v0 = vld [vmem:[#allocation9 + $0x38] sm:$0xff]  ;;  %v1935_v2 = vld [vmem:[#allocation9 + $0x30] sm:$0xff]  ;;  %v1934_v4 = vld [vmem:[#allocation9 + $0x28] sm:$0xff]  ;;  %vm841_vm0 = vcmask 130048   ;;  %s2437_s12 = smov 112   ;;  %s2438_s6 = smov 96  }
  0x71   : > { %2410 = vsyncadd (%p3062_p5), [#allocation13], 4294965248  ;;  %v1945_v1 = vld [vmem:[#allocation11 + $0x38] sm:$0xff]  ;;  %631 = vmatpush.bf16.msra.mxu0 %v1936_v0  ;;  %v1944_v3 = vld [vmem:[#allocation11 + $0x30] sm:$0xff]  ;;  %s2439_s20 = smov 80   ;;  %s2440_s3 = smov 64  }
  0x72   : > { %723 = vmatpush.bf16.msra.mxu1 %v1945_v1  ;;  %v1943_v5 = vld [vmem:[#allocation11 + $0x28] sm:$0xff]  ;;  %v1954_v6 = vld [vmem:[#allocation12 + $0x38] sm:$0xff]  ;;  %v1953_v7 = vld [vmem:[#allocation12 + $0x30] sm:$0xff]  ;;  %s2441_s4 = smov 16   ;;  %s2442_s30 = smov 48   ;;  %vm910_vm1 = vcmask 125952  }
  0x73   : > { %815 = vmatpush.bf16.msra.mxu2 %v1954_v6  ;;  %v1933_v8 = vld [vmem:[#allocation9 + $0x20] sm:$0xff]  ;;  %v1952_v10 = vld [vmem:[#allocation12 + $0x28] sm:$0xff]  ;;  %v1932_v11 = vld [vmem:[#allocation9 + $0x18] sm:$0xff]  ;;  %s2443_s24 = smov 32   ;;  %vm990_vm2 = vcmask 257152   ;;  %vm1070_vm3 = vcmask 388352  }
  0x74   : > { %v1942_v9 = vld [vmem:[#allocation11 + $0x20] sm:$0xff]  ;;  %v1941_v12 = vld [vmem:[#allocation11 + $0x18] sm:$0xff]  ;;  %v1931_v14 = vld [vmem:[#allocation9 + $0x10] sm:$0xff]  ;;  %vm1150_vm4 = vcmask 519552   ;;  %vm1230_vm5 = vcmask 650752   ;;  %vm1310_vm6 = vcmask 781952  }
  0x75   : > { %632 = vmatpush.bf16.msra.mxu0 %v1935_v2  ;;  %v1951_v13 = vld [vmem:[#allocation12 + $0x20] sm:$0xff]  ;;  %v1940_v15 = vld [vmem:[#allocation11 + $0x10] sm:$0xff]  ;;  %v1950_v16 = vld [vmem:[#allocation12 + $0x18] sm:$0xff]  ;;  %vm1390_vm7 = vcmask 913152   ;;  %vm1470_vm8 = vcmask 1044352   ;;  %s1759_s26 = sshll.u32 %s2691_s15, 4 }
  0x76   : > { %724 = vmatpush.bf16.msra.mxu1 %v1944_v3  ;;  %v1930_v17 = vld [vmem:[#allocation9 + $0x8] sm:$0xff]  ;;  %v1949_v19 = vld [vmem:[#allocation12 + $0x10] sm:$0xff]  ;;  %v1929_v20 = vld [vmem:[#allocation9] sm:$0xff]  ;;  %s1964_s11 = sshll.u32 %s2527_s21, 4  ;;  %s553_s28 = scalar_lea.vmem [#allocation15], %s1759_s26 }
  0x77   : > { %816 = vmatpush.bf16.msra.mxu2 %v1953_v7  ;;  %v1939_v18 = vld [vmem:[#allocation11 + $0x8] sm:$0xff]  ;;  %v1938_v21 = vld [vmem:[#allocation11] sm:$0xff]  ;;  %v1928_v23 = vld [vmem:[%s464_s22] sm:$0xff]  ;;  %s3063_s23 = sld [smem:[#allocation31_spill]]  ;;  %s1578_s13 = sshll.u32 %s553_s28, 4  ;;  %s1579_s13 = int_to_ptr.vmem [resolvable:$true] %s1578_s13 }
  0x78   : > { %v1948_v22 = vld [vmem:[#allocation12 + $0x8] sm:$0xff]  ;;  %v1947_v25 = vld [vmem:[#allocation12] sm:$0xff]  ;;  %v1946_v26 = vld [vmem:[%s484_s14] sm:$0xff] }
  0x79   : > { %633 = vmatpush.bf16.msra.mxu0 %v1934_v4  ;;  %v1937_v24 = vld [vmem:[%s474_s25] sm:$0xff] }
  0x7a   : > { %725 = vmatpush.bf16.msra.mxu1 %v1943_v5  ;;  %v2074_v29 = vld [vmem:[%s3018_s8] ss:$0 sm:$0xff] }
  0x7b   : > { %817 = vmatpush.bf16.msra.mxu2 %v1952_v10  ;;  %v2073_v31 = vld [vmem:[%s3017_s7] ss:$0 sm:$0xff] }
  0x7c   : > { %v2075_v48 = vld [vmem:[%s3019_s9] ss:$0 sm:$0xff] }
  0x7d   : > { %634 = vmatpush.bf16.msra.mxu0 %v1933_v8  ;;  %s1577_s16 = scalar_lea.hbm %s3063_s23, %s1964_s11 }
  0x7e   : > { %726 = vmatpush.bf16.msra.mxu1 %v1942_v9  ;;  %s1580_s1 = sshll.u32 %s1577_s16, 4  ;;  %s1581_s1 = int_to_ptr.hbm [resolvable:$true] %s1580_s1 }
  0x7f   : > { %818 = vmatpush.bf16.msra.mxu2 %v1951_v13 }
  0x81   : > { %635 = vmatpush.bf16.msra.mxu0 %v1932_v11 }
  0x82   : > { %727 = vmatpush.bf16.msra.mxu1 %v1941_v12 }
  0x83   : > { %819 = vmatpush.bf16.msra.mxu2 %v1950_v16 }
  0x85   : > { %636 = vmatpush.bf16.msra.mxu0 %v1931_v14 }
  0x86   : > { %728 = vmatpush.bf16.msra.mxu1 %v1940_v15 }
  0x87   : > { %820 = vmatpush.bf16.msra.mxu2 %v1949_v19 }
  0x89   : > { %637 = vmatpush.bf16.msra.mxu0 %v1930_v17 }
  0x8a   : > { %729 = vmatpush.bf16.msra.mxu1 %v1939_v18 }
  0x8b   : > { %821 = vmatpush.bf16.msra.mxu2 %v1948_v22 }
  0x8d   : > { %638 = vmatpush.bf16.msra.mxu0 %v1929_v20 }
  0x8e   : > { %730 = vmatpush.bf16.msra.mxu1 %v1938_v21 }
  0x8f   : > { %822 = vmatpush.bf16.msra.mxu2 %v1947_v25 }
  0x90   : > { %639 = vmatmul.bf16.vlgmr.msra.gmra.mxu0 %v1928_v23 }
  0x91   : > { %731 = vmatmul.bf16.vlgmr.msra.gmra.mxu1 %v1937_v24 }
  0x92   : > { %823 = vmatmul.bf16.vlgmr.msra.gmra.mxu2 %v1946_v26 }
 0x10d   : > { %v640_v27 = vpop.f32.mrf.mxu0 }
 0x10e   : > { %v732_v28 = vpop.f32.mrf.mxu1  ;;  %v641_v36 = vadd.f32 %v2073_v31, %v640_v27 }
 0x10f   : > { %v733_v30 = vadd.f32 %v2074_v29, %v732_v28 }
 0x110   : > { %v645_v41 = vpack.c.bf16 %v641_v36, %v641_v36 }
 0x111   : > { %v737_v34 = vpack.c.bf16 %v733_v30, %v733_v30 }
 0x112   : > { %v833_v45 = vunpack.c.l.b16 %v645_v41 }
 0x113   : > { %v838_v39 = vunpack.c.l.b16 %v737_v34 }
 0x115   : > { %v642_v32 = vpop.f32.mrf.mxu0  ;;  %v824_v49 = vpop.f32.mrf.mxu2 }
 0x116   : > { %v734_v33 = vpop.f32.mrf.mxu1  ;;  %v643_v37 = vadd.f32 %v2073_v31, %v642_v32  ;;  %v825_v50 = vadd.f32 %v2075_v48, %v824_v49 }
 0x117   : > { %v735_v35 = vadd.f32 %v2074_v29, %v734_v33 }
 0x118   : > { %v646_v42 = vpack.c.bf16 %v643_v37, %v643_v37  ;;  %v829_v51 = vpack.c.bf16 %v825_v50, %v825_v50 }
 0x119   : > { %v738_v38 = vpack.c.bf16 %v735_v35, %v735_v35 }
 0x11a   : > { %v834_v46 = vunpack.c.l.b16 %v646_v42  ;;  %v887_v54 = vunpack.c.l.b16 %v829_v51 }
 0x11b   : > { %v839_v40 = vunpack.c.l.b16 %v738_v38 }
 0x11c   : > { %v2735_v47 = vpack.c.b16 %v834_v46, %v833_v45 }
 0x11d   : > { %v2729_v43 = vpack.c.b16 %v839_v40, %v838_v39  ;;  %v826_v52 = vpop.f32.mrf.mxu2 }
 0x11e   : > { %v827_v53 = vadd.f32 %v2075_v48, %v826_v52 }
 0x11f   : > { %915 = vrot.lane.b32.xlu2 %v2729_v43, %s2437_s12  ;;  %v846_v44 = vsel %vm841_vm0, %v2729_v43, 0 }
 0x120   : > { %855 = vmatpush.bf16.xpose.msra.mxu3 %v846_v44  ;;  %v830_v55 = vpack.c.bf16 %v827_v53, %v827_v53 }
 0x122   : > { %v888_v56 = vunpack.c.l.b16 %v830_v55 }
 0x124   : > { %v2748_v57 = vpack.c.b16 %v888_v56, %v887_v54 }
 0x127   : > { %913 = vrot.lane.b32.xlu2 %v2735_v47, %s2437_s12  ;;  %1868 = vmatmul.msk.bf16.vlgmr.msra.gmra.mxu3 %vm841_vm0, %v2735_v47 }
 0x128   : > { %901 = vmatpush.bf16.msrb.mxu3 %v2748_v57 }
 0x12f   : > { %993 = vrot.lane.b32.xlu2 %v2735_v47, %s2438_s6 }
 0x137   : > { %1073 = vrot.lane.b32.xlu2 %v2735_v47, %s2439_s20 }
 0x13f   : > { %1155 = vrot.lane.b32.xlu2 %v2729_v43, %s2440_s3 }
 0x147   : > { %1153 = vrot.lane.b32.xlu2 %v2735_v47, %s2440_s3 }
 0x14f   : > { %1395 = vrot.lane.b32.xlu2 %v2729_v43, %s2441_s4 }
 0x179   : > { %v916_v58 = vpop.permute.xlu2 %915 }
 0x17a   : > { %v921_v59 = vsel %vm841_vm0, %v916_v58, 0 }
 0x17b   : > { %930 = vmatpush.bf16.xpose.msra.mxu3 %v921_v59 }
 0x181   : > { %v2758_v60 = vpop.permute.xlu2 %913 }
 0x189   : > { %v994_v61 = vpop.permute.xlu2 %993 }
 0x191   : > { %v2760_v62 = vpop.permute.xlu2 %1073 }
 0x199   : > { %v1156_v63 = vpop.permute.xlu2 %1155 }
 0x19a   : > { %v1161_v0 = vsel %vm841_vm0, %v1156_v63, 0 }
 0x19b   : > { %1170 = vmatpush.bf16.xpose.msrb.mxu1 %v1161_v0 }
 0x1a1   : > { %v1154_v1 = vpop.permute.xlu2 %1153 }
 0x1a2   : > { %1876 = vmatmul.msk.bf16.vlgmr.msrb.gmra.mxu1 %vm841_vm0, %v1154_v1 }
 0x1a9   : > { %v1396_v40 = vpop.permute.xlu2 %1395 }
 0x1aa   : > { %v857_v2 = vpop.f32.mrf.mxu3  ;;  %v1401_v41 = vsel %vm841_vm0, %v1396_v40, 0 }
 0x1ab   : > { %v862_v3 = vsel %vm841_vm0, %v857_v2, -inf }
 0x1ac   : > { %863 = vmax.xlane.f32.xlu0 %v862_v3 }
 0x1b2   : > { %v859_v4 = vpop.f32.mrf.mxu3 }
 0x1b3   : > { %v865_v5 = vsel %vm841_vm0, %v859_v4, -inf }
 0x1b4   : > { %866 = vmax.xlane.f32.xlu0 %v865_v5 }
 0x1c8   : > { %995 = vrot.lane.b32.xlu0 %v2729_v43, %s2438_s6 }
 0x1d0   : > { %1235 = vrot.lane.b32.xlu0 %v2729_v43, %s2442_s30 }
 0x1d8   : > { %1315 = vrot.lane.b32.xlu0 %v2729_v43, %s2443_s24 }
 0x1e0   : > { %1393 = vrot.lane.b32.xlu0 %v2735_v47, %s2441_s4 }
 0x21f   : > { %v864_v6 = vpop.xlane.xlu0 %863  ;;  %v2785_v21 = vpop.f32.mrf.mxu1 }
 0x220   : > { %v868_v7 = vsub.f32 %v857_v2, %v864_v6  ;;  %v1177_v42 = vsel %vm841_vm0, %v2785_v21, -inf }
 0x222   : > { %v870_v8 = vmul.f32 1.442695, %v868_v7 }
 0x224   : > { %2077 = vpow2.f32 %v870_v8 }
 0x227   : > { %v867_v9 = vpop.xlane.xlu0 %866  ;;  %v2787_v22 = vpop.f32.mrf.mxu1 }
 0x228   : > { %v869_v10 = vsub.f32 %v859_v4, %v867_v9  ;;  %v1180_v23 = vsel %vm841_vm0, %v2787_v22, -inf }
 0x22a   : > { %v2078_v11 = vpop.eup %2077  ;;  %v872_v12 = vmul.f32 1.442695, %v869_v10 }
 0x22b   : > { %v874_v13 = vsel %vm841_vm0, %v2078_v11, 0.0 }
 0x22c   : > { %2079 = vpow2.f32 %v872_v12  ;;  %875 = vadd.xlane.f32.xlu1 %v874_v13 }
 0x232   : > { %v2080_v14 = vpop.eup %2079 }
 0x233   : > { %v877_v15 = vsel %vm841_vm0, %v2080_v14, 0.0 }
 0x234   : > { %878 = vadd.xlane.f32.xlu1 %v877_v15 }
 0x23a   : > { %v996_v16 = vpop.permute.xlu0 %995 }
 0x23b   : > { %v1001_v17 = vsel %vm841_vm0, %v996_v16, 0 }
 0x23c   : > { %1010 = vmatpush.bf16.xpose.msrb.mxu2 %v1001_v17 }
 0x242   : > { %v1236_v18 = vpop.permute.xlu0 %1235 }
 0x243   : > { %1872 = vmatmul.msk.bf16.vlgmr.msrb.gmra.mxu2 %vm841_vm0, %v994_v61  ;;  %v1241_v33 = vsel %vm841_vm0, %v1236_v18, 0 }
 0x24a   : > { %v1316_v19 = vpop.permute.xlu0 %1315 }
 0x24b   : > { %v1321_v20 = vsel %vm841_vm0, %v1316_v19, 0 }
 0x24c   : > { %1330 = vmatpush.bf16.xpose.msra.mxu1 %v1321_v20 }
 0x24d   : > { %1075 = vrot.lane.b32.xlu1 %v2729_v43, %s2439_s20 }
 0x252   : > { %v1394_v43 = vpop.permute.xlu0 %1393 }
 0x255   : > { %1233 = vrot.lane.b32.xlu1 %v2735_v47, %s2442_s30 }
 0x25d   : > { %1313 = vrot.lane.b32.xlu1 %v2735_v47, %s2443_s24 }
 0x287   : > { %1181 = vmax.xlane.f32.xlu1 %v1180_v23 }
 0x29f   : > { %v876_v24 = vpop.xlane.xlu1 %875 }
 0x2a0   : > { %2081 = vrcp.f32 %v876_v24 }
 0x2a6   : > { %v2082_v26 = vpop.eup %2081 }
 0x2a7   : > { %v879_v25 = vpop.xlane.xlu1 %878  ;;  %v882_v28 = vmul.f32 %v2082_v26, %v2078_v11 }
 0x2a8   : > { %2083 = vrcp.f32 %v879_v25 }
 0x2ae   : > { %v2084_v27 = vpop.eup %2083 }
 0x2af   : > { %v883_v29 = vmul.f32 %v2084_v27, %v2080_v14 }
 0x2b1   : > { %v884_v30 = vpack.c.bf16 %v883_v29, %v882_v28 }
 0x2b3   : > { %1869 = vmatmul.msk.bf16.vlgmr.msrb.gmra.mxu3 %vm841_vm0, %v884_v30 }
 0x2bf   : > { %v1076_v31 = vpop.permute.xlu1 %1075 }
 0x2c0   : > { %v1081_v32 = vsel %vm841_vm0, %v1076_v31, 0 }
 0x2c1   : > { %1090 = vmatpush.bf16.xpose.msrb.mxu3 %v1081_v32 }
 0x2c3   : > { %1870 = vmatmul.msk.bf16.vlgmr.msra.gmra.mxu3 %vm841_vm0, %v2758_v60 }
 0x2c6   : > { %v1012_v34 = vpop.f32.mrf.mxu2 }
 0x2c7   : > { %v1234_v35 = vpop.permute.xlu1 %1233  ;;  %v1017_v36 = vsel %vm841_vm0, %v1012_v34, -inf }
 0x2c8   : > { %1018 = vmax.xlane.f32.xlu0 %v1017_v36 }
 0x2c9   : > { %1250 = vmatpush.bf16.xpose.msra.mxu3 %v1241_v33 }
 0x2ce   : > { %v1014_v37 = vpop.f32.mrf.mxu2 }
 0x2cf   : > { %v1314_v38 = vpop.permute.xlu1 %1313  ;;  %v1020_v39 = vsel %vm841_vm0, %v1014_v37, -inf }
 0x2d0   : > { %1021 = vmax.xlane.f32.xlu2 %v1020_v39  ;;  %1880 = vmatmul.msk.bf16.vlgmr.msra.gmra.mxu1 %vm841_vm0, %v1314_v38 }
 0x2d3   : > { %1874 = vmatmul.msk.bf16.vlgmr.msrb.gmra.mxu3 %vm841_vm0, %v2760_v62 }
 0x2d4   : > { %1410 = vmatpush.bf16.xpose.msrb.mxu3 %v1401_v41 }
 0x2d8   : > { %1178 = vmax.xlane.f32.xlu2 %v1177_v42 }
 0x2e3   : > { %1878 = vmatmul.msk.bf16.vlgmr.msra.gmra.mxu3 %vm841_vm0, %v1234_v35 }
 0x2f3   : > { %1882 = vmatmul.msk.bf16.vlgmr.msrb.gmra.mxu3 %vm841_vm0, %v1394_v43 }
 0x2fa   : > { %v1182_v6 = vpop.xlane.xlu1 %1181 }
 0x2fb   : > { %v1184_v7 = vsub.f32 %v2787_v22, %v1182_v6 }
 0x2fd   : > { %v1187_v10 = vmul.f32 1.442695, %v1184_v7 }
 0x336   : > { %v903_v44 = vpop.f32.mrf.mxu3 }
 0x337   : > { %v908_v45 = vpack.c.bf16 %v903_v44, %v903_v44 }
 0x339   : > { %911 = vst.msk [vmem:[#allocation2] sm:$0xf] %vm910_vm1, %v908_v45 }
 0x33b   : > { %v1019_v53 = vpop.xlane.xlu0 %1018 }
 0x33c   : > { %v1023_v54 = vsub.f32 %v1012_v34, %v1019_v53 }
 0x33e   : > { %v905_v46 = vpop.f32.mrf.mxu3  ;;  %v1025_v60 = vmul.f32 1.442695, %v1023_v54 }
 0x33f   : > { %v909_v47 = vpack.c.bf16 %v905_v46, %v905_v46 }
 0x341   : > { %912 = vst.msk [vmem:[#allocation2 + $0x4] sm:$0xf] %vm910_vm1, %v909_v47 }
 0x343   : > { %v1022_v48 = vpop.xlane.xlu2 %1021 }
 0x344   : > { %v1024_v49 = vsub.f32 %v1014_v37, %v1022_v48 }
 0x346   : > { %v1027_v50 = vmul.f32 1.442695, %v1024_v49  ;;  %v932_v51 = vpop.f32.mrf.mxu3 }
 0x347   : > { %v937_v52 = vsel %vm841_vm0, %v932_v51, -inf }
 0x348   : > { %2085 = vpow2.f32 %v1027_v50  ;;  %938 = vmax.xlane.f32.xlu2 %v937_v52 }
 0x349   : > { %2087 = vpow2.f32 %v1025_v60 }
 0x34a   : > { %2089 = vpow2.f32 %v1187_v10 }
 0x34b   : > { %v1179_v9 = vpop.xlane.xlu2 %1178 }
 0x34c   : > { %v1183_v11 = vsub.f32 %v2785_v21, %v1179_v9 }
 0x34d   : > { %v2807_v55 = vpop.f32.mrf.mxu1 }
 0x34e   : > { %v2809_v56 = vpop.eup %2085  ;;  %v1337_v58 = vsel %vm841_vm0, %v2807_v55, -inf  ;;  %v934_v61 = vpop.f32.mrf.mxu3  ;;  %v1185_v13 = vmul.f32 1.442695, %v1183_v11 }
 0x34f   : > { %1338 = vmax.xlane.f32.xlu1 %v1337_v58  ;;  %v1032_v59 = vsel %vm841_vm0, %v2809_v56, 0.0  ;;  %v940_v63 = vsel %vm841_vm0, %v934_v61, -inf  ;;  %v2088_v1 = vpop.eup %2087 }
 0x350   : > { %1033 = vadd.xlane.f32.xlu2 %v1032_v59  ;;  %v1029_v2 = vsel %vm841_vm0, %v2088_v1, 0.0  ;;  %2091 = vpow2.f32 %v1185_v13  ;;  %v2840_v16 = vpop.eup %2089 }
 0x351   : > { %v1192_v18 = vsel %vm841_vm0, %v2840_v16, 0.0 }
 0x355   : > { %v2815_v62 = vpop.f32.mrf.mxu1 }
 0x356   : > { %v1340_v0 = vsel %vm841_vm0, %v2815_v62, -inf  ;;  %v2823_v3 = vpop.f32.mrf.mxu3  ;;  %v2846_v19 = vpop.eup %2091 }
 0x357   : > { %941 = vmax.xlane.f32.xlu1 %v940_v63  ;;  %1341 = vmax.xlane.f32.xlu0 %v1340_v0  ;;  %v1097_v17 = vsel %vm841_vm0, %v2823_v3, -inf  ;;  %v1189_v20 = vsel %vm841_vm0, %v2846_v19, 0.0 }
 0x35e   : > { %v2829_v4 = vpop.f32.mrf.mxu3 }
 0x35f   : > { %1030 = vadd.xlane.f32.xlu0 %v1029_v2  ;;  %v1100_v21 = vsel %vm841_vm0, %v2829_v4, -inf }
 0x366   : > { %v2831_v5 = vpop.f32.mrf.mxu3 }
 0x367   : > { %v1257_v24 = vsel %vm841_vm0, %v2831_v5, -inf }
 0x368   : > { %1120 = vrot.lane.b32.xlu2 %v2748_v57, %s2439_s20 }
 0x36e   : > { %v1254_v8 = vpop.f32.mrf.mxu3 }
 0x36f   : > { %v1260_v12 = vsel %vm841_vm0, %v1254_v8, -inf }
 0x370   : > { %960 = vrot.lane.b32.xlu1 %v2748_v57, %s2437_s12 }
 0x373   : > { %1040 = vrot.lane.b32.xlu0 %v2748_v57, %s2438_s6 }
 0x376   : > { %v2836_v14 = vpop.f32.mrf.mxu3 }
 0x377   : > { %v1417_v15 = vsel %vm841_vm0, %v2836_v14, -inf }
 0x37e   : > { %v2852_v22 = vpop.f32.mrf.mxu3 }
 0x37f   : > { %v1420_v23 = vsel %vm841_vm0, %v2852_v22, -inf }
 0x391   : > { %1261 = vmax.xlane.f32.xlu2 %v1260_v12 }
 0x399   : > { %1418 = vmax.xlane.f32.xlu2 %v1417_v15 }
 0x39a   : > { %1098 = vmax.xlane.f32.xlu1 %v1097_v17 }
 0x39d   : > { %1193 = vadd.xlane.f32.xlu0 %v1192_v18 }
 0x3a2   : > { %1190 = vadd.xlane.f32.xlu1 %v1189_v20 }
 0x3a5   : > { %1101 = vmax.xlane.f32.xlu0 %v1100_v21 }
 0x3aa   : > { %1421 = vmax.xlane.f32.xlu1 %v1420_v23 }
 0x3ad   : > { %1258 = vmax.xlane.f32.xlu0 %v1257_v24 }
 0x3bb   : > { %v939_v25 = vpop.xlane.xlu2 %938 }
 0x3bc   : > { %v943_v26 = vsub.f32 %v932_v51, %v939_v25 }
 0x3be   : > { %v945_v27 = vmul.f32 1.442695, %v943_v26 }
 0x3c0   : > { %2093 = vpow2.f32 %v945_v27 }
 0x3c2   : > { %v2858_v28 = vpop.xlane.xlu1 %1338 }
 0x3c3   : > { %v1034_v38 = vpop.xlane.xlu2 %1033  ;;  %v1343_v10 = vsub.f32 %v2807_v55, %v2858_v28 }
 0x3c5   : > { %v1345_v13 = vmul.f32 1.442695, %v1343_v10 }
 0x3c6   : > { %v2860_v29 = vpop.eup %2093 }
 0x3c7   : > { %v949_v30 = vsel %vm841_vm0, %v2860_v29, 0.0 }
 0x3c8   : > { %950 = vadd.xlane.f32.xlu0 %v949_v30 }
 0x3ca   : > { %v942_v31 = vpop.xlane.xlu1 %941  ;;  %v2864_v34 = vpop.xlane.xlu0 %1341 }
 0x3cb   : > { %v944_v32 = vsub.f32 %v934_v61, %v942_v31  ;;  %v1121_v42 = vpop.permute.xlu2 %1120 }
 0x3cd   : > { %v947_v33 = vmul.f32 1.442695, %v944_v32 }
 0x3cf   : > { %2095 = vpow2.f32 %v947_v33 }
 0x3d2   : > { %v1031_v37 = vpop.xlane.xlu0 %1030 }
 0x3d3   : > { %2097 = vrcp.f32 %v1031_v37 }
 0x3d4   : > { %2099 = vrcp.f32 %v1034_v38 }
 0x3d5   : > { %v2866_v35 = vpop.eup %2095 }
 0x3d6   : > { %v952_v36 = vsel %vm841_vm0, %v2866_v35, 0.0 }
 0x3d7   : > { %953 = vadd.xlane.f32.xlu2 %v952_v36 }
 0x3d9   : > { %v2098_v39 = vpop.eup %2097 }
 0x3da   : > { %v2100_v40 = vpop.eup %2099  ;;  %v1037_v43 = vmul.f32 %v2098_v39, %v2088_v1 }
 0x3db   : > { %v1038_v44 = vmul.f32 %v2100_v40, %v2809_v56 }
 0x3dd   : > { %v1039_v46 = vpack.c.bf16 %v1038_v44, %v1037_v43 }
 0x3e2   : > { %v961_v41 = vpop.permute.xlu1 %960 }
 0x3e3   : > { %973 = vmatpush.bf16.msrb.mxu0 %v961_v41 }
 0x3e5   : > { %v1041_v45 = vpop.permute.xlu0 %1040 }
 0x3e6   : > { %1053 = vmatpush.bf16.msra.mxu2 %v1041_v45 }
 0x3e7   : > { %1133 = vmatpush.bf16.msra.mxu0 %v1121_v42 }
 0x3e9   : > { %1873 = vmatmul.msk.bf16.vlgmr.msra.gmra.mxu2 %vm841_vm0, %v1039_v46 }
 0x404   : > { %v1262_v47 = vpop.xlane.xlu2 %1261 }
 0x405   : > { %v1264_v48 = vsub.f32 %v1254_v8, %v1262_v47 }
 0x407   : > { %v1267_v49 = vmul.f32 1.442695, %v1264_v48 }
 0x409   : > { %2101 = vpow2.f32 %v1267_v49 }
 0x40c   : > { %v1419_v20 = vpop.xlane.xlu2 %1418 }
 0x40d   : > { %v1099_v50 = vpop.xlane.xlu1 %1098  ;;  %v1423_v21 = vsub.f32 %v2836_v14, %v1419_v20 }
 0x40e   : > { %v1103_v51 = vsub.f32 %v2823_v3, %v1099_v50 }
 0x40f   : > { %v2873_v52 = vpop.eup %2101  ;;  %v1425_v24 = vmul.f32 1.442695, %v1423_v21 }
 0x410   : > { %v1105_v53 = vmul.f32 1.442695, %v1103_v51  ;;  %v1194_v54 = vpop.xlane.xlu0 %1193  ;;  %v1272_v58 = vsel %vm841_vm0, %v2873_v52, 0.0 }
 0x411   : > { %1273 = vadd.xlane.f32.xlu1 %v1272_v58 }
 0x412   : > { %2103 = vpow2.f32 %v1105_v53 }
 0x413   : > { %2105 = vrcp.f32 %v1194_v54 }
 0x415   : > { %v1191_v56 = vpop.xlane.xlu1 %1190 }
 0x416   : > { %2107 = vrcp.f32 %v1191_v56 }
 0x418   : > { %v2877_v59 = vpop.eup %2103  ;;  %v1102_v60 = vpop.xlane.xlu0 %1101 }
 0x419   : > { %v1104_v61 = vsub.f32 %v2829_v4, %v1102_v60  ;;  %v1109_v63 = vsel %vm841_vm0, %v2877_v59, 0.0  ;;  %v2106_v0 = vpop.eup %2105 }
 0x41a   : > { %1110 = vadd.xlane.f32.xlu0 %v1109_v63  ;;  %v2883_v3 = vmul.f32 %v2106_v0, %v2840_v16 }
 0x41b   : > { %v1107_v1 = vmul.f32 1.442695, %v1104_v61 }
 0x41c   : > { %v2108_v2 = vpop.eup %2107 }
 0x41d   : > { %v2886_v6 = vmul.f32 %v2108_v2, %v2846_v19  ;;  %2109 = vpow2.f32 %v1107_v1  ;;  %v1422_v23 = vpop.xlane.xlu1 %1421 }
 0x41e   : > { %v1424_v25 = vsub.f32 %v2852_v22, %v1422_v23 }
 0x41f   : > { %v1199_v7 = vpack.c.bf16 %v2883_v3, %v2886_v6 }
 0x420   : > { %v1259_v8 = vpop.xlane.xlu0 %1258  ;;  %v1427_v27 = vmul.f32 1.442695, %v1424_v25 }
 0x421   : > { %v1263_v4 = vsub.f32 %v2831_v5, %v1259_v8  ;;  %v1344_v5 = vsub.f32 %v2815_v62, %v2864_v34 }
 0x423   : > { %v2891_v9 = vpop.eup %2109  ;;  %v1265_v11 = vmul.f32 1.442695, %v1263_v4  ;;  %v1347_v55 = vmul.f32 1.442695, %v1344_v5 }
 0x424   : > { %v1112_v12 = vsel %vm841_vm0, %v2891_v9, 0.0 }
 0x425   : > { %2111 = vpow2.f32 %v1265_v11  ;;  %1113 = vadd.xlane.f32.xlu2 %v1112_v12 }
 0x426   : > { %2113 = vpow2.f32 %v1345_v13 }
 0x427   : > { %2115 = vpow2.f32 %v1347_v55 }
 0x42a   : > { %1200 = vrot.lane.b32.xlu1 %v2748_v57, %s2440_s3 }
 0x42b   : > { %v2899_v15 = vpop.eup %2111 }
 0x42c   : > { %v1269_v16 = vsel %vm841_vm0, %v2899_v15, 0.0  ;;  %v2907_v17 = vpop.eup %2113 }
 0x42d   : > { %1270 = vadd.xlane.f32.xlu2 %v1269_v16  ;;  %v1349_v18 = vsel %vm841_vm0, %v2907_v17, 0.0  ;;  %v2911_v19 = vpop.eup %2115 }
 0x42e   : > { %1280 = vrot.lane.b32.xlu0 %v2748_v57, %s2442_s30  ;;  %v1352_v62 = vsel %vm841_vm0, %v2911_v19, 0.0 }
 0x435   : > { %1350 = vadd.xlane.f32.xlu2 %v1349_v18 }
 0x43b   : > { %v951_v26 = vpop.xlane.xlu0 %950 }
 0x43c   : > { %2117 = vrcp.f32 %v951_v26 }
 0x43d   : > { %1353 = vadd.xlane.f32.xlu2 %v1352_v62  ;;  %2119 = vpow2.f32 %v1425_v24 }
 0x442   : > { %v2118_v30 = vpop.eup %2117 }
 0x443   : > { %v2917_v31 = vpop.eup %2119  ;;  %v957_v33 = vmul.f32 %v2118_v30, %v2860_v29 }
 0x444   : > { %v1429_v14 = vsel %vm841_vm0, %v2917_v31, 0.0 }
 0x44a   : > { %v954_v28 = vpop.xlane.xlu2 %953 }
 0x44b   : > { %2121 = vrcp.f32 %v954_v28 }
 0x44c   : > { %2123 = vpow2.f32 %v1427_v27 }
 0x451   : > { %v2122_v32 = vpop.eup %2121 }
 0x452   : > { %v958_v34 = vmul.f32 %v2122_v32, %v2866_v35  ;;  %v2124_v36 = vpop.eup %2123 }
 0x453   : > { %v1432_v37 = vsel %vm841_vm0, %v2124_v36, 0.0 }
 0x454   : > { %1430 = vadd.xlane.f32.xlu1 %v1429_v14  ;;  %v959_v22 = vpack.c.bf16 %v958_v34, %v957_v33 }
 0x455   : > { %1360 = vrot.lane.b32.xlu2 %v2748_v57, %s2443_s24 }
 0x456   : > { %1871 = vmatmul.msk.bf16.vlgmr.msrb.gmra.mxu0 %vm841_vm0, %v959_v22 }
 0x458   : > { %1433 = vadd.xlane.f32.xlu0 %v1432_v37 }
 0x45d   : > { %1440 = vrot.lane.b32.xlu2 %v2748_v57, %s2441_s4 }
 0x46c   : > { %v1055_v29 = vpop.f32.mrf.mxu2 }
 0x46d   : > { %v1060_v38 = vpack.c.bf16 %v1055_v29, %v1055_v29 }
 0x46f   : > { %1064 = vrot.lane.b32.xlu0 %v1060_v38, %s2443_s24 }
 0x474   : > { %v1057_v35 = vpop.f32.mrf.mxu2 }
 0x475   : > { %v1061_v39 = vpack.c.bf16 %v1057_v35, %v1057_v35 }
 0x477   : > { %1066 = vrot.lane.b32.xlu2 %v1061_v39, %s2443_s24  ;;  %v1963_v39 = vld [vmem:[#allocation14 + $0x38] sm:$0xff] }
 0x478   : > { %1549 = vmatpush.bf16.msrb.mxu1 %v1963_v39 }
 0x484   : > { %v1274_v40 = vpop.xlane.xlu1 %1273 }
 0x48d   : > { %v1111_v41 = vpop.xlane.xlu0 %1110 }
 0x48e   : > { %2125 = vrcp.f32 %v1111_v41  ;;  %v1961_v41 = vld [vmem:[#allocation14 + $0x28] sm:$0xff] }
 0x494   : > { %v2126_v44 = vpop.eup %2125 }
 0x495   : > { %v1117_v46 = vmul.f32 %v2126_v44, %v2877_v59 }
 0x498   : > { %v1114_v42 = vpop.xlane.xlu2 %1113 }
 0x499   : > { %2127 = vrcp.f32 %v1114_v42  ;;  %v1960_v42 = vld [vmem:[#allocation14 + $0x20] sm:$0xff] }
 0x49c   : > { %v1201_v43 = vpop.permute.xlu1 %1200 }
 0x49d   : > { %1213 = vmatpush.bf16.msrb.mxu2 %v1201_v43  ;;  %v1959_v43 = vld [vmem:[#allocation14 + $0x18] sm:$0xff] }
 0x49f   : > { %v2128_v45 = vpop.eup %2127 }
 0x4a0   : > { %v1118_v57 = vmul.f32 %v2128_v45, %v2891_v9  ;;  %1877 = vmatmul.msk.bf16.vlgmr.msrb.gmra.mxu2 %vm841_vm0, %v1199_v7  ;;  %v1271_v47 = vpop.xlane.xlu2 %1270  ;;  %v1281_v48 = vpop.permute.xlu0 %1280  ;;  %v1958_v45 = vld [vmem:[#allocation14 + $0x10] sm:$0xff] }
 0x4a1   : > { %1293 = vmatpush.bf16.msrb.mxu0 %v1281_v48  ;;  %2129 = vrcp.f32 %v1271_v47  ;;  %v1956_v47 = vld [vmem:[#allocation14] sm:$0xff] }
 0x4a2   : > { %v1119_v49 = vpack.c.bf16 %v1118_v57, %v1117_v46  ;;  %2131 = vrcp.f32 %v1274_v40  ;;  %v1962_v40 = vld [vmem:[#allocation14 + $0x30] sm:$0xff]  ;;  %v1957_v46 = vld [vmem:[#allocation14 + $0x8] sm:$0xff] }
 0x4a3   : > { %1550 = vmatpush.bf16.msrb.mxu1 %v1962_v40 }
 0x4a4   : > { %1875 = vmatmul.msk.bf16.vlgmr.msra.gmra.mxu0 %vm841_vm0, %v1119_v49 }
 0x4a7   : > { %v2130_v51 = vpop.eup %2129  ;;  %1551 = vmatpush.bf16.msrb.mxu1 %v1961_v41 }
 0x4a8   : > { %v1351_v50 = vpop.xlane.xlu2 %1350  ;;  %v2132_v53 = vpop.eup %2131  ;;  %v1277_v54 = vmul.f32 %v2130_v51, %v2899_v15 }
 0x4a9   : > { %2133 = vrcp.f32 %v1351_v50  ;;  %v1278_v58 = vmul.f32 %v2132_v53, %v2873_v52 }
 0x4ab   : > { %v1279_v59 = vpack.c.bf16 %v1278_v58, %v1277_v54  ;;  %1552 = vmatpush.bf16.msrb.mxu1 %v1960_v42  ;;  %v2076_v58 = vld [vmem:[%s3020_s10] ss:$0 sm:$0xff] }
 0x4af   : > { %v2134_v60 = vpop.eup %2133  ;;  %1553 = vmatpush.bf16.msrb.mxu1 %v1959_v43 }
 0x4b0   : > { %v1354_v56 = vpop.xlane.xlu2 %1353  ;;  %v1357_v63 = vmul.f32 %v2134_v60, %v2907_v17 }
 0x4b1   : > { %2135 = vrcp.f32 %v1354_v56 }
 0x4b3   : > { %1554 = vmatpush.bf16.msrb.mxu1 %v1958_v45 }
 0x4b4   : > { %1879 = vmatmul.msk.bf16.vlgmr.msrb.gmra.mxu0 %vm841_vm0, %v1279_v59 }
 0x4b7   : > { %v2136_v61 = vpop.eup %2135  ;;  %1555 = vmatpush.bf16.msrb.mxu1 %v1957_v46 }
 0x4b8   : > { %v1358_v0 = vmul.f32 %v2136_v61, %v2911_v19  ;;  %v1361_v1 = vpop.permute.xlu2 %1360 }
 0x4b9   : > { %1373 = vmatpush.bf16.msra.mxu2 %v1361_v1 }
 0x4ba   : > { %v1359_v2 = vpack.c.bf16 %v1358_v0, %v1357_v63 }
 0x4bb   : > { %1556 = vmatpush.bf16.msrb.mxu1 %v1956_v47 }
 0x4bc   : > { %1881 = vmatmul.msk.bf16.vlgmr.msra.gmra.mxu2 %vm841_vm0, %v1359_v2 }
 0x4c0   : > { %v1441_v3 = vpop.permute.xlu2 %1440 }
 0x4c1   : > { %1453 = vmatpush.bf16.msra.mxu0 %v1441_v3 }
 0x4c7   : > { %v1431_v6 = vpop.xlane.xlu1 %1430 }
 0x4c8   : > { %2137 = vrcp.f32 %v1431_v6 }
 0x4cb   : > { %v1434_v52 = vpop.xlane.xlu0 %1433 }
 0x4cc   : > { %2139 = vrcp.f32 %v1434_v52 }
 0x4ce   : > { %v2138_v7 = vpop.eup %2137 }
 0x4cf   : > { %v1437_v4 = vmul.f32 %v2138_v7, %v2917_v31 }
 0x4d1   : > { %v2949_v17 = vpop.permute.xlu2 %1066 }
 0x4d2   : > { %v2140_v8 = vpop.eup %2139 }
 0x4d3   : > { %v1438_v9 = vmul.f32 %v2140_v8, %v2124_v36  ;;  %v975_v10 = vpop.f32.mrf.mxu0 }
 0x4d4   : > { %v980_v11 = vpack.c.bf16 %v975_v10, %v975_v10 }
 0x4d5   : > { %v1439_v12 = vpack.c.bf16 %v1438_v9, %v1437_v4 }
 0x4d6   : > { %984 = vrot.lane.b32.xlu2 %v980_v11, %s2441_s4 }
 0x4d7   : > { %1883 = vmatmul.msk.bf16.vlgmr.msra.gmra.mxu0 %vm841_vm0, %v1439_v12 }
 0x4db   : > { %v977_v13 = vpop.f32.mrf.mxu0 }
 0x4dc   : > { %v981_v32 = vpack.c.bf16 %v977_v13, %v977_v13 }
 0x4e1   : > { %v1065_v23 = vpop.permute.xlu0 %1064 }
 0x521   : > { %v1135_v15 = vpop.f32.mrf.mxu0 }
 0x522   : > { %v1140_v5 = vpack.c.bf16 %v1135_v15, %v1135_v15 }
 0x523   : > { %v1215_v16 = vpop.f32.mrf.mxu2 }
 0x524   : > { %v1220_v55 = vpack.c.bf16 %v1215_v16, %v1215_v16  ;;  %1144 = vrot.lane.b32.xlu2 %v1140_v5, %s2442_s30 }
 0x526   : > { %1224 = vrot.lane.b32.xlu0 %v1220_v55, %s2440_s3 }
 0x529   : > { %v1137_v18 = vpop.f32.mrf.mxu0 }
 0x52a   : > { %v1141_v19 = vpack.c.bf16 %v1137_v18, %v1137_v18 }
 0x52b   : > { %v1217_v62 = vpop.f32.mrf.mxu2 }
 0x52c   : > { %v1221_v20 = vpack.c.bf16 %v1217_v62, %v1217_v62  ;;  %1146 = vrot.lane.b32.xlu2 %v1141_v19, %s2442_s30 }
 0x52e   : > { %1226 = vrot.lane.b32.xlu1 %v1221_v20, %s2440_s3 }
 0x530   : > { %v985_v21 = vpop.permute.xlu2 %984 }
 0x531   : > { %991 = vst.msk [vmem:[#allocation2] sm:$0xf] %vm990_vm2, %v985_v21  ;;  %v1295_v24 = vpop.f32.mrf.mxu0 }
 0x532   : > { %v1300_v25 = vpack.c.bf16 %v1295_v24, %v1295_v24  ;;  %1071 = vst.msk [vmem:[#allocation2] sm:$0xf] %vm1070_vm3, %v1065_v23 }
 0x534   : > { %1304 = vrot.lane.b32.xlu2 %v1300_v25, %s2439_s20 }
 0x539   : > { %v1297_v26 = vpop.f32.mrf.mxu0 }
 0x53a   : > { %v1301_v27 = vpack.c.bf16 %v1297_v26, %v1297_v26 }
 0x53c   : > { %1306 = vrot.lane.b32.xlu0 %v1301_v27, %s2439_s20  ;;  %s2371_s20 = scalar_lea.hbm %s3063_s23, 32 }
 0x53f   : > { %v1375_v28 = vpop.f32.mrf.mxu2 }
 0x540   : > { %v1380_v30 = vpack.c.bf16 %v1375_v28, %v1375_v28 }
 0x542   : > { %1384 = vrot.lane.b32.xlu1 %v1380_v30, %s2438_s6 }
 0x547   : > { %v1377_v31 = vpop.f32.mrf.mxu2 }
 0x548   : > { %v1381_v33 = vpack.c.bf16 %v1377_v31, %v1377_v31 }
 0x54a   : > { %986 = vrot.lane.b32.xlu1 %v981_v32, %s2441_s4  ;;  %1386 = vrot.lane.b32.xlu2 %v1381_v33, %s2438_s6  ;;  %s2365_s6 = sshra.s32 %s1581_s1, 4  ;;  %s2366_s6 = int_to_ptr.hbm [resolvable:$true] %s2365_s6 }
 0x54b   : > { %s2367_s5 = scalar_lea.hbm %s2366_s6, 16  ;;  %p2372_p11 = scmp.lt.s32.totalorder %s2366_s6, %s3063_s23 }
 0x54c   : > { %p2368_p4 = scmp.ne.s32.totalorder %s2366_s6, %s2367_s5  ;;  %p2373_p2 = scmp.lt.s32.totalorder %s2371_s20, %s2367_s5 }
 0x54e   : > { %p2369_p7 = pnand %p2368_p4, %p2586_p3  ;;  %p2374_p10 = por %p2373_p2, %p2372_p11 }
 0x550   : > { %p2370_p1 = pneg %p2369_p7 }
 0x552   : > { %p2375_p13 = pnand %p2374_p10, %p2370_p1 }
 0x554   : > { %v1455_v34 = vpop.f32.mrf.mxu0 }
 0x555   : > { %v1460_v14 = vpack.c.bf16 %v1455_v34, %v1455_v34 }
 0x557   : > { %1464 = vrot.lane.b32.xlu0 %v1460_v14, %s2437_s12 }
 0x55c   : > { %v1457_v36 = vpop.f32.mrf.mxu0 }
 0x55d   : > { %v1461_v22 = vpack.c.bf16 %v1457_v36, %v1457_v36 }
 0x55f   : > { %1466 = vrot.lane.b32.xlu1 %v1461_v22, %s2437_s12  ;;  %s1566_s12 = scalar_lea.sflag [#allocation5], %s2691_s15 }
 0x57e   : > { %v1145_v37 = vpop.permute.xlu2 %1144 }
 0x57f   : > { %1151 = vst.msk [vmem:[#allocation2] sm:$0xf] %vm1150_vm4, %v1145_v37 }
 0x586   : > { %v1147_v29 = vpop.permute.xlu2 %1146 }
 0x58e   : > { %v1305_v35 = vpop.permute.xlu2 %1304 }
 0x598   : > { %v1225_v38 = vpop.permute.xlu0 %1224 }
 0x599   : > { %1231 = vst.msk [vmem:[#allocation2] sm:$0xf] %vm1230_vm5, %v1225_v38 }
 0x59a   : > { %1311 = vst.msk [vmem:[#allocation2] sm:$0xf] %vm1310_vm6, %v1305_v35 }
 0x5a0   : > { %v1227_v44 = vpop.permute.xlu1 %1226 }
 0x5a4   : > { %v1387_v50 = vpop.permute.xlu2 %1386 }
 0x5ae   : > { %v1307_v49 = vpop.permute.xlu0 %1306 }
 0x5b4   : > { %v1385_v57 = vpop.permute.xlu1 %1384 }
 0x5b5   : > { %1391 = vst.msk [vmem:[#allocation2] sm:$0xf] %vm1390_vm7, %v1385_v57 }
 0x5bc   : > { %v987_v48 = vpop.permute.xlu1 %986 }
 0x5bd   : > { %992 = vst.msk [vmem:[#allocation2 + $0x4] sm:$0xf] %vm990_vm2, %v987_v48 }
 0x5be   : > { %1072 = vst.msk [vmem:[#allocation2 + $0x4] sm:$0xf] %vm1070_vm3, %v2949_v17 }
 0x5bf   : > { %1152 = vst.msk [vmem:[#allocation2 + $0x4] sm:$0xf] %vm1150_vm4, %v1147_v29 }
 0x5c0   : > { %1232 = vst.msk [vmem:[#allocation2 + $0x4] sm:$0xf] %vm1230_vm5, %v1227_v44 }
 0x5c1   : > { %1312 = vst.msk [vmem:[#allocation2 + $0x4] sm:$0xf] %vm1310_vm6, %v1307_v49 }
 0x5c2   : > { %1392 = vst.msk [vmem:[#allocation2 + $0x4] sm:$0xf] %vm1390_vm7, %v1387_v50 }
 0x5c9   : > { %v1465_v51 = vpop.permute.xlu0 %1464 }
 0x5ca   : > { %1471 = vst.msk [vmem:[#allocation2] sm:$0xf] %vm1470_vm8, %v1465_v51 }
 0x5d1   : > { %v1467_v53 = vpop.permute.xlu1 %1466 }
 0x5d2   : > { %1472 = vst.msk [vmem:[#allocation2 + $0x4] sm:$0xf] %vm1470_vm8, %v1467_v53 }
 0x5d9   : > { %v1955_v54 = vld [vmem:[#allocation2] sm:$0xff] }
 0x5da   : > { %1557 = vmatmul.bf16.vlgmr.msrb.gmra.mxu1 %v1955_v54 }
 0x657   : > { %v1558_v56 = vpop.f32.mrf.mxu1 }
 0x658   : > { %v1559_v59 = vadd.f32 %v2076_v58, %v1558_v56 }
 0x65a   : > { %1563 = vst [vmem:[%s553_s28] sm:$0xff] %v1559_v59 }
 0x65f   : > { %v1560_v60 = vpop.f32.mrf.mxu1 }
 0x660   : > { %v1561_v61 = vadd.f32 %v2076_v58, %v1560_v60 }
 0x662   : > { %1564 = vst [vmem:[%s553_s28 + $0x8] sm:$0xff] %v1561_v61 }
 0x663   : > { %2378 = shalt.err (!%p2375_p13)
}
 0x664   : > { %s2444_s15 = smov 128   ;;  %s2445_s30 = smov 8  }
 0x665   : > { %1987 = dma.vmem_to_hbm [thread:$0]  (%p2586_p3), %s1579_s13, 256, %s1581_s1, %s1566_s12, %s2444_s15, %s2444_s15, %s2445_s30  }
 0x666 PF: > { %s3064_s24 = sld [smem:[#allocation21_spill]] }
 0x667   : > { %s3066_s17 = sld [smem:[#allocation22_spill]] }
 0x66c   : > { %s1595_s22 = sand.u32 1, %s3064_s24  }
 0x66d   : > { %p3067_p0 = scmp.ge.s32.totalorder %s3066_s17, 2  ;;  %s1596_s11 = scalar_lea.sflag [#allocation5], %s1595_s22 }
 0x66f   : > { %p2013_p8 = pnand %p3067_p0, %p2541_p6 }
 0x671   : > { %p2014_p9 = pneg %p2013_p8 }
 0x673   : > { %2412 = dma.done.wait (%p2014_p9), %s1596_s11, 256  }
 0x674   : > { %2414 = vsyncadd (%p2014_p9), %s1596_s11, 4294967040  ;;  %s3068_s20 = sld [smem:[#allocation24_spill]]  ;;  %s3070_s17 = smov %s2421_s18 }
 0x675   : > { %s3069_s28 = sld [smem:[#allocation25_spill]]  ;;  %s3071_s18 = smov %s2425_s19 }
 0x67a   : > { %p29_p12 = scmp.ge.s32.totalorder %s3068_s20, 4  }
 0x67b   : > { %s3072_s19 = smov %s3069_s28 }
 0x67c   :  { %31 = sbr.rel (!%p29_p12) target bundleno = 16 (0x10), region = 149 }
 0x681   :  { %1602 = vsyncpa [#allocation4], 1 }
 0x682   :  { %1604 = vsyncpa [#allocation4 + $0x1], 1 }
 0x683   :  { %1605 = vsyncpa [#allocation7], 1 }
 0x684   :  { %1607 = vsyncpa [#allocation7 + $0x1], 1 }
 0x685   :  { %1608 = vsyncpa [#allocation10], 1 }
 0x686   :  { %1609 = vsyncpa [#allocation13], 1 }
 0x687   :  { %1610 = vsyncpa [#allocation5], 1 }
 0x688   :  { %1612 = vsyncpa [#allocation5 + $0x1], 1 }

</bundles_post_ra>
